<compile_context>
chip_gen: v7x
topology: tpu7x:2x2x1
jax: 0.10.0
libtpu: 0.0.40
codegen_flags: <defaults>
</compile_context>

<pallas_src>
import jax
import jax.numpy as jnp
from jax import lax
from jax.experimental import pallas as pl
from jax.experimental.pallas import tpu as pltpu

CPAD = 128                       # output-channel storage = lane width (keeps stores lane-dense)
_EPS = 1e-5
_VMEM_LIMIT = 16 * 1024 * 1024   # far above actual use (~2 MiB); safe on v5e/v6e/v7x


def _round_up(x, m):
    return (x + m - 1) // m * m


# ----------------------------- Pallas kernels ------------------------------

def _block_kernel(p_ref, w_ref, b_ref, o_ref):
    # One RepVGG block: all three branches folded into a single weight -> one MXU matmul.
    acc = jnp.dot(p_ref[...], w_ref[...], preferred_element_type=jnp.float32)
    o_ref[...] = jnp.maximum(acc + b_ref[...], 0.0).astype(o_ref.dtype)


def _make_tail_kernel(n_layers):
    """Fused tail: chain of n_layers (matmul + bias) layers kept entirely in VMEM.
    ReLU between all layers except after the last (the last layer is GAP+linear folded)."""
    def kernel(*refs):
        o_ref = refs[-1]
        a = refs[0][...]
        for li in range(n_layers):
            w = refs[1 + 2 * li][...]
            b = refs[2 + 2 * li][...]
            a = jnp.dot(a, w, preferred_element_type=jnp.float32) + b
            if li < n_layers - 1:
                a = jnp.maximum(a, 0.0)
        o_ref[...] = a.astype(o_ref.dtype)
    return kernel


def _full_spec(shape):
    nd = len(shape)
    return pl.BlockSpec(shape, lambda *a, nd=nd: (0,) * nd)


def _pick_m_tile(M):
    """Single grid step on 1-TC chips (v5e/v6e); 2-way M split on v7x (2 TensorCores)."""
    try:
        kind = jax.devices()[0].device_kind.lower()
    except Exception:
        kind = ""
    if "v7" in kind and M % 2 == 0 and (M // 2) % 8 == 0:
        return M // 2
    return M


def repvgg_block_pallas(patches, w, b, m_tile=None):
    M, K = patches.shape
    CP = w.shape[1]
    TM = M if (m_tile is None or M % m_tile) else m_tile
    return pl.pallas_call(
        _block_kernel,
        out_shape=jax.ShapeDtypeStruct((M, CP), jnp.float32),
        grid_spec=pltpu.PrefetchScalarGridSpec(
            num_scalar_prefetch=0,
            grid=(M // TM,),
            in_specs=[pl.BlockSpec((TM, K), lambda i: (i, 0)),   # streamed patch tiles
                      pl.BlockSpec((K, CP), lambda i: (0, 0)),   # resident weight
                      pl.BlockSpec((1, CP), lambda i: (0, 0))],  # resident bias
            out_specs=pl.BlockSpec((TM, CP), lambda i: (i, 0)),
        ),
        compiler_params=pltpu.CompilerParams(
            dimension_semantics=("parallel",),
            vmem_limit_bytes=_VMEM_LIMIT),
    )(patches, w, b)


def fused_tail_pallas(act, tail):
    """tail = [(W, b), ...]; act: (N, K0).  Single pallas_call; everything full-extent in VMEM."""
    N = act.shape[0]
    flat = []
    for w_, b_ in tail:
        flat += [w_, b_]
    out_w = tail[-1][0].shape[1]
    return pl.pallas_call(
        _make_tail_kernel(len(tail)),
        out_shape=jax.ShapeDtypeStruct((N, out_w), jnp.float32),
        in_specs=[_full_spec(act.shape)] + [_full_spec(a.shape) for a in flat],
        out_specs=_full_spec((N, out_w)),
        compiler_params=pltpu.CompilerParams(vmem_limit_bytes=_VMEM_LIMIT),
    )(act, *flat)


# ------------------------------- JAX glue -----------------------------------

def im2col_3x3(x, stride):
    """x: (N, H, W, C) NHWC, pad=1, 3x3 window -> (N*Ho*Wo, 9*C) patch matrix (tap-major)."""
    N, H, W, C = x.shape
    xp = jnp.pad(x, ((0, 0), (1, 1), (1, 1), (0, 0)))
    Ho = (H + 2 - 3) // stride + 1
    Wo = (W + 2 - 3) // stride + 1
    cols = []
    for dh in range(3):
        for dw in range(3):
            cols.append(lax.slice(
                xp, (0, dh, dw, 0),
                (N, dh + (Ho - 1) * stride + 1, dw + (Wo - 1) * stride + 1, C),
                (1, stride, stride, 1)))
    patches = jnp.stack(cols, axis=3)              # (N, Ho, Wo, 9, C), tap index = dh*3+dw
    return patches.reshape(N * Ho * Wo, 9 * C), Ho, Wo


def make_block_params(key, cin, cout, stride):
    has_id = (cin == cout and stride == 1)
    ks = jax.random.split(key, 12)
    u = lambda k, s: jax.random.uniform(k, s, jnp.float32, 0.5, 1.5)
    n = lambda k, s, sc=0.1: sc * jax.random.normal(k, s, jnp.float32)
    p = dict(
        w3=n(ks[0], (cout, cin, 3, 3), 0.2),
        g3=u(ks[1], (cout,)), b3=n(ks[2], (cout,)),
        m3=n(ks[3], (cout,)), v3=u(ks[4], (cout,)),
        w1=n(ks[5], (cout, cin, 1, 1), 0.2),
        g1=u(ks[6], (cout,)), b1=n(ks[7], (cout,)),
        m1=n(ks[8], (cout,)), v1=u(ks[9], (cout,)),
        stride=stride, cin=cin, cout=cout, has_id=has_id,
    )
    if has_id:
        p.update(gid=u(ks[10], (cout,)), bid=n(ks[11], (cout,)),
                 mid=jnp.zeros((cout,), jnp.float32), vid=jnp.ones((cout,), jnp.float32))
    return p


def fold_block_hwio(p):
    """Exact RepVGG re-param: eval-mode BN folded into each branch; 1x1 and identity-BN
    branches merged into the center tap of the 3x3 kernel.  Returns HWIO weight + bias."""
    t3 = p['g3'] / jnp.sqrt(p['v3'] + _EPS)
    w = (p['w3'] * t3[:, None, None, None]).transpose(2, 3, 1, 0)   # (3,3,cin,cout)
    b = p['b3'] - p['m3'] * t3
    t1 = p['g1'] / jnp.sqrt(p['v1'] + _EPS)
    w1 = (p['w1'][:, :, 0, 0] * t1[:, None]).T                       # (cin, cout)
    b = b + p['b1'] - p['m1'] * t1
    if p['has_id']:
        tid = p['gid'] / jnp.sqrt(p['vid'] + _EPS)
        w1 = w1 + jnp.diag(tid)
        b = b + p['bid'] - p['mid'] * tid
    w = w.at[1, 1].add(w1)                                           # fold into center tap
    return w, b


def _dense_conv_map(w_hwio, bias, Hin, Win, stride, in_store, out_store):
    """Exact dense matrix of a 3x3/pad-1 conv on a tiny spatial grid:
    (Hin*Win*cin) flat -> (Hout*Wout*cout) flat, zero-padded to lane-friendly storage.
    Built ONCE at fold time (host-side reparameterization, not part of the forward)."""
    cin, cout = w_hwio.shape[2], w_hwio.shape[3]
    Hout = (Hin + 2 - 3) // stride + 1
    Wout = (Win + 2 - 3) // stride + 1
    k_in, k_out = Hin * Win * cin, Hout * Wout * cout
    eye = jnp.eye(k_in, dtype=jnp.float32).reshape(k_in, Hin, Win, cin)
    cols = lax.conv_general_dilated(eye, w_hwio, (stride, stride), [(1, 1), (1, 1)],
                                    dimension_numbers=('NHWC', 'HWIO', 'NHWC'))
    M = cols.reshape(k_in, k_out)
    W = jnp.zeros((in_store, out_store), jnp.float32).at[:k_in, :k_out].set(M)
    b = (jnp.zeros((1, out_store), jnp.float32)
         .at[0, :k_out].set(jnp.tile(bias, Hout * Wout)))
    return W, b


def build_params(raw_blocks, wl, bl, num_classes, H0, W0, n_patch_blocks=2):
    """Package folded weights: first n_patch_blocks as im2col-matmul weights (K = 9*cin,
    rounded to 8), the rest + GAP + linear as a fused chain of dense matmuls."""
    patch_blocks, tail = [], []
    H, W = H0, W0
    for i, p in enumerate(raw_blocks):
        w_hwio, bias = fold_block_hwio(p)
        s, cin, cout = p['stride'], p['cin'], p['cout']
        Ho, Wo = (H + 2 - 3) // s + 1, (W + 2 - 3) // s + 1
        if i < n_patch_blocks:
            kpad = _round_up(9 * cin, 8)                 # no 9*CPAD blow-up
            Wp = (jnp.zeros((kpad, CPAD), jnp.float32)
                  .at[:9 * cin, :cout].set(w_hwio.reshape(9 * cin, cout)))
            bp = jnp.zeros((1, CPAD), jnp.float32).at[0, :cout].set(bias)
            patch_blocks.append(dict(w=Wp, b=bp, stride=s, cin=cin))
        else:
            in_store = _round_up(H * W * cin, 128)
            out_store = _round_up(Ho * Wo * cout, 128)
            tail.append(_dense_conv_map(w_hwio, bias, H, W, s, in_store, out_store))
        H, W = Ho, Wo
    # GAP + linear folded: logits = act_flat @ tile(wl / (H*W)) + bl
    c_final = raw_blocks[-1]['cout']
    k_head = H * W * c_final
    in_store = _round_up(k_head, 128)
    Wh = (jnp.zeros((in_store, CPAD), jnp.float32)
          .at[:k_head, :num_classes].set(jnp.tile(wl / (H * W), (H * W, 1))))
    bh = jnp.zeros((1, CPAD), jnp.float32).at[0, :num_classes].set(bl)
    tail.append((Wh, bh))
    tail_cin = raw_blocks[n_patch_blocks]['cin']
    return patch_blocks, tail, tail_cin


def repvgg_quant_forward(x_nchw, patch_blocks, tail, tail_cin, num_classes):
    x = jnp.transpose(x_nchw, (0, 2, 3, 1)).astype(jnp.float32)   # NCHW -> NHWC
    N = x.shape[0]
    for bi, blk in enumerate(patch_blocks):
        # slice back to the real channel count so the im2col stream carries no padded lanes
        patches, Ho, Wo = im2col_3x3(x[..., :blk['cin']], blk['stride'])
        kpad = blk['w'].shape[0]
        if patches.shape[1] < kpad:                      # block 0 only: 27 -> 32
            patches = jnp.pad(patches, ((0, 0), (0, kpad - patches.shape[1])))
        m_tile = _pick_m_tile(patches.shape[0]) if bi == 0 else None
        x = repvgg_block_pallas(patches, blk['w'], blk['b'], m_tile).reshape(N, Ho, Wo, CPAD)
    # fused tail: remaining RepVGG blocks + GAP + linear in one pallas_call
    act = x[..., :tail_cin].reshape(N, -1)
    k0 = tail[0][0].shape[0]
    if act.shape[1] < k0:
        act = jnp.pad(act, ((0, 0), (0, k0 - act.shape[1])))
    logits = fused_tail_pallas(act, tail)
    return logits[:, :num_classes]


# ------------------------- pure-JAX reference check --------------------------

def _bn(y, g, b, m, v):
    return (y - m) / jnp.sqrt(v + _EPS) * g + b


def block_ref(x, p):
    s = p['stride']
    dn = ('NHWC', 'HWIO', 'NHWC')
    y3 = lax.conv_general_dilated(x, p['w3'].transpose(2, 3, 1, 0), (s, s),
                                  [(1, 1), (1, 1)], dimension_numbers=dn)
    y3 = _bn(y3, p['g3'], p['b3'], p['m3'], p['v3'])
    y1 = lax.conv_general_dilated(x, p['w1'].transpose(2, 3, 1, 0), (s, s),
                                  [(0, 0), (0, 0)], dimension_numbers=dn)
    y1 = _bn(y1, p['g1'], p['b1'], p['m1'], p['v1'])
    out = y3 + y1
    if p['has_id']:
        out = out + _bn(x, p['gid'], p['bid'], p['mid'], p['vid'])
    return jax.nn.relu(out)


def forward_ref(x_nchw, raw_blocks, wl, bl):
    x = jnp.transpose(x_nchw, (0, 2, 3, 1)).astype(jnp.float32)
    for p in raw_blocks:
        x = block_ref(x, p)
    pooled = jnp.mean(x, axis=(1, 2))            # GAP -> (N, C)
    return pooled @ wl + bl


# ----------------------------------- main ------------------------------------

if __name__ == "__main__":
    key = jax.random.PRNGKey(0)

    # tiny synthetic RepVGG: (cin, cout, stride); identity branch auto when cin==cout & stride==1
    cfg = [
        (3, 8, 2),    # stage0
        (8, 8, 2),    # stage1
        (8, 16, 2),   # stage2
        (16, 16, 2),  # stage3 block 0
        (16, 16, 1),  # stage3 block 1  (has identity-BN branch)
        (16, 32, 1),  # stage4
    ]
    num_classes = 10
    keys = jax.random.split(key, len(cfg) + 3)
    raw_blocks = [make_block_params(keys[i], *c) for i, c in enumerate(cfg)]

    c_final = cfg[-1][1]
    wl = 0.1 * jax.random.normal(keys[-3], (c_final, num_classes), jnp.float32)  # linear.weight.T
    bl = 0.1 * jax.random.normal(keys[-2], (num_classes,), jnp.float32)          # linear.bias

    x = jax.random.normal(keys[-1], (2, 3, 32, 32), jnp.float32)  # NCHW like PyTorch

    patch_blocks, tail, tail_cin = build_params(
        raw_blocks, wl, bl, num_classes, x.shape[2], x.shape[3], n_patch_blocks=2)

    fwd = jax.jit(lambda xin: repvgg_quant_forward(xin, patch_blocks, tail, tail_cin,
                                                   num_classes))
    out = jax.block_until_ready(fwd(x))

    ref = jax.block_until_ready(forward_ref(x, raw_blocks, wl, bl))
    assert out.shape == (2, num_classes)
    assert jnp.allclose(out, ref, atol=1e-3, rtol=1e-3), (out, ref)

    print("KERNEL_OK")
</pallas_src>

<mosaic_0001>
module attributes {stable_mosaic.version = 11 : i64} {
  func.func @_block_kernel(%arg0: i32, %arg1: memref<512x32xf32, #tpu.memory_space<vmem>>, %arg2: memref<32x128xf32, #tpu.memory_space<vmem>>, %arg3: memref<1x128xf32, #tpu.memory_space<vmem>>, %arg4: memref<512x128xf32, #tpu.memory_space<vmem>>) attributes {dimension_semantics = [#tpu.dimension_semantics<parallel>], iteration_bounds = array<i64: 1>, scalar_prefetch = 0 : i64, scratch_operands = 0 : i64, tpu.core_type = #tpu.core_type<tc>, window_params = [{transform_indices = @transform_0, window_bounds = array<i64: 512, 32>}, {pipeline_mode = #tpu.pipeline_mode<synchronous>, transform_indices = @transform_1, window_bounds = array<i64: 32, 128>}, {pipeline_mode = #tpu.pipeline_mode<synchronous>, transform_indices = @transform_2, window_bounds = array<i64: 1, 128>}, {transform_indices = @transform_3, window_bounds = array<i64: 512, 128>}]} {
    %c0 = arith.constant 0 : index
    %c0_0 = arith.constant 0 : index
    %0 = vector.load %arg1[%c0, %c0_0] : memref<512x32xf32, #tpu.memory_space<vmem>>, vector<512x32xf32>
    %c0_1 = arith.constant 0 : index
    %c0_2 = arith.constant 0 : index
    %1 = vector.load %arg2[%c0_1, %c0_2] : memref<32x128xf32, #tpu.memory_space<vmem>>, vector<32x128xf32>
    %cst = arith.constant dense<0.000000e+00> : vector<512x128xf32>
    %2 = tpu.matmul %0, %1, %cst {dimension_numbers = #tpu.dot_dimension_numbers<[1], [0], [0], [1], [0, 0, 1, 1], [], []>} : vector<512x32xf32>, vector<32x128xf32>, vector<512x128xf32> -> vector<512x128xf32>
    %c0_3 = arith.constant 0 : index
    %c0_4 = arith.constant 0 : index
    %3 = vector.load %arg3[%c0_3, %c0_4] : memref<1x128xf32, #tpu.memory_space<vmem>>, vector<1x128xf32>
    %4 = vector.broadcast %3 : vector<1x128xf32> to vector<512x128xf32>
    %5 = arith.addf %2, %4 : vector<512x128xf32>
    %cst_5 = arith.constant 0.000000e+00 : f32
    %6 = vector.broadcast %cst_5 : f32 to vector<512x128xf32>
    %7 = arith.maximumf %5, %6 : vector<512x128xf32>
    %c0_6 = arith.constant 0 : index
    %c0_7 = arith.constant 0 : index
    %8 = vector.load %arg4[%c0_6, %c0_7] : memref<512x128xf32, #tpu.memory_space<vmem>>, vector<512x128xf32>
    tpu.vector_store %arg4[%c0_6, %c0_7], %7 {strides = array<i32>} : memref<512x128xf32, #tpu.memory_space<vmem>>, vector<512x128xf32>,
    return
  }
  func.func @transform_0(%arg0: i32) -> (i32, i32) {
    %c0_i32 = arith.constant 0 : i32
    %c0_i32_0 = arith.constant 0 : i32
    return %arg0, %c0_i32 : i32, i32
  }
  func.func @transform_1(%arg0: i32) -> (i32, i32) {
    %c0_i32 = arith.constant 0 : i32
    %c0_i32_0 = arith.constant 0 : i32
    %c0_i32_1 = arith.constant 0 : i32
    return %c0_i32, %c0_i32_0 : i32, i32
  }
  func.func @transform_2(%arg0: i32) -> (i32, i32) {
    %c0_i32 = arith.constant 0 : i32
    %c0_i32_0 = arith.constant 0 : i32
    %c0_i32_1 = arith.constant 0 : i32
    return %c0_i32, %c0_i32_0 : i32, i32
  }
  func.func @transform_3(%arg0: i32) -> (i32, i32) {
    %c0_i32 = arith.constant 0 : i32
    %c0_i32_0 = arith.constant 0 : i32
    return %arg0, %c0_i32 : i32, i32
  }
}

module attributes {stable_mosaic.version = 11 : i64} {
  func.func @_block_kernel(%arg0: i32, %arg1: memref<128x72xf32, #tpu.memory_space<vmem>>, %arg2: memref<72x128xf32, #tpu.memory_space<vmem>>, %arg3: memref<1x128xf32, #tpu.memory_space<vmem>>, %arg4: memref<128x128xf32, #tpu.memory_space<vmem>>) attributes {dimension_semantics = [#tpu.dimension_semantics<parallel>], iteration_bounds = array<i64: 1>, scalar_prefetch = 0 : i64, scratch_operands = 0 : i64, tpu.core_type = #tpu.core_type<tc>, window_params = [{transform_indices = @transform_0, window_bounds = array<i64: 128, 72>}, {pipeline_mode = #tpu.pipeline_mode<synchronous>, transform_indices = @transform_1, window_bounds = array<i64: 72, 128>}, {pipeline_mode = #tpu.pipeline_mode<synchronous>, transform_indices = @transform_2, window_bounds = array<i64: 1, 128>}, {transform_indices = @transform_3, window_bounds = array<i64: 128, 128>}]} {
    %c0 = arith.constant 0 : index
    %c0_0 = arith.constant 0 : index
    %0 = vector.load %arg1[%c0, %c0_0] : memref<128x72xf32, #tpu.memory_space<vmem>>, vector<128x72xf32>
    %c0_1 = arith.constant 0 : index
    %c0_2 = arith.constant 0 : index
    %1 = vector.load %arg2[%c0_1, %c0_2] : memref<72x128xf32, #tpu.memory_space<vmem>>, vector<72x128xf32>
    %cst = arith.constant dense<0.000000e+00> : vector<128x128xf32>
    %2 = tpu.matmul %0, %1, %cst {dimension_numbers = #tpu.dot_dimension_numbers<[1], [0], [0], [1], [0, 0, 1, 1], [], []>} : vector<128x72xf32>, vector<72x128xf32>, vector<128x128xf32> -> vector<128x128xf32>
    %c0_3 = arith.constant 0 : index
    %c0_4 = arith.constant 0 : index
    %3 = vector.load %arg3[%c0_3, %c0_4] : memref<1x128xf32, #tpu.memory_space<vmem>>, vector<1x128xf32>
    %4 = vector.broadcast %3 : vector<1x128xf32> to vector<128x128xf32>
    %5 = arith.addf %2, %4 : vector<128x128xf32>
    %cst_5 = arith.constant 0.000000e+00 : f32
    %6 = vector.broadcast %cst_5 : f32 to vector<128x128xf32>
    %7 = arith.maximumf %5, %6 : vector<128x128xf32>
    %c0_6 = arith.constant 0 : index
    %c0_7 = arith.constant 0 : index
    %8 = vector.load %arg4[%c0_6, %c0_7] : memref<128x128xf32, #tpu.memory_space<vmem>>, vector<128x128xf32>
    tpu.vector_store %arg4[%c0_6, %c0_7], %7 {strides = array<i32>} : memref<128x128xf32, #tpu.memory_space<vmem>>, vector<128x128xf32>,
    return
  }
  func.func @transform_0(%arg0: i32) -> (i32, i32) {
    %c0_i32 = arith.constant 0 : i32
    %c0_i32_0 = arith.constant 0 : i32
    return %arg0, %c0_i32 : i32, i32
  }
  func.func @transform_1(%arg0: i32) -> (i32, i32) {
    %c0_i32 = arith.constant 0 : i32
    %c0_i32_0 = arith.constant 0 : i32
    %c0_i32_1 = arith.constant 0 : i32
    return %c0_i32, %c0_i32_0 : i32, i32
  }
  func.func @transform_2(%arg0: i32) -> (i32, i32) {
    %c0_i32 = arith.constant 0 : i32
    %c0_i32_0 = arith.constant 0 : i32
    %c0_i32_1 = arith.constant 0 : i32
    return %c0_i32, %c0_i32_0 : i32, i32
  }
  func.func @transform_3(%arg0: i32) -> (i32, i32) {
    %c0_i32 = arith.constant 0 : i32
    %c0_i32_0 = arith.constant 0 : i32
    return %arg0, %c0_i32 : i32, i32
  }
}

module attributes {stable_mosaic.version = 11 : i64} {
  func.func @kernel(%arg0: memref<2x512xf32, #tpu.memory_space<vmem>>, %arg1: memref<512x256xf32, #tpu.memory_space<vmem>>, %arg2: memref<1x256xf32, #tpu.memory_space<vmem>>, %arg3: memref<256x128xf32, #tpu.memory_space<vmem>>, %arg4: memref<1x128xf32, #tpu.memory_space<vmem>>, %arg5: memref<128x128xf32, #tpu.memory_space<vmem>>, %arg6: memref<1x128xf32, #tpu.memory_space<vmem>>, %arg7: memref<128x128xf32, #tpu.memory_space<vmem>>, %arg8: memref<1x128xf32, #tpu.memory_space<vmem>>, %arg9: memref<128x128xf32, #tpu.memory_space<vmem>>, %arg10: memref<1x128xf32, #tpu.memory_space<vmem>>, %arg11: memref<2x128xf32, #tpu.memory_space<vmem>>) attributes {dimension_semantics = [], scalar_prefetch = 0 : i64, scratch_operands = 0 : i64, tpu.core_type = #tpu.core_type<tc>} {
    %c0 = arith.constant 0 : index
    %c0_0 = arith.constant 0 : index
    %0 = vector.load %arg0[%c0, %c0_0] : memref<2x512xf32, #tpu.memory_space<vmem>>, vector<2x512xf32>
    %c0_1 = arith.constant 0 : index
    %c0_2 = arith.constant 0 : index
    %1 = vector.load %arg1[%c0_1, %c0_2] : memref<512x256xf32, #tpu.memory_space<vmem>>, vector<512x256xf32>
    %c0_3 = arith.constant 0 : index
    %c0_4 = arith.constant 0 : index
    %2 = vector.load %arg2[%c0_3, %c0_4] : memref<1x256xf32, #tpu.memory_space<vmem>>, vector<1x256xf32>
    %cst = arith.constant dense<0.000000e+00> : vector<2x256xf32>
    %3 = tpu.matmul %0, %1, %cst {dimension_numbers = #tpu.dot_dimension_numbers<[1], [0], [0], [1], [0, 0, 1, 1], [], []>} : vector<2x512xf32>, vector<512x256xf32>, vector<2x256xf32> -> vector<2x256xf32>
    %4 = vector.broadcast %2 : vector<1x256xf32> to vector<2x256xf32>
    %5 = arith.addf %3, %4 : vector<2x256xf32>
    %cst_5 = arith.constant 0.000000e+00 : f32
    %6 = vector.broadcast %cst_5 : f32 to vector<2x256xf32>
    %7 = arith.maximumf %5, %6 : vector<2x256xf32>
    %c0_6 = arith.constant 0 : index
    %c0_7 = arith.constant 0 : index
    %8 = vector.load %arg3[%c0_6, %c0_7] : memref<256x128xf32, #tpu.memory_space<vmem>>, vector<256x128xf32>
    %c0_8 = arith.constant 0 : index
    %c0_9 = arith.constant 0 : index
    %9 = vector.load %arg4[%c0_8, %c0_9] : memref<1x128xf32, #tpu.memory_space<vmem>>, vector<1x128xf32>
    %cst_10 = arith.constant dense<0.000000e+00> : vector<2x128xf32>
    %10 = tpu.matmul %7, %8, %cst_10 {dimension_numbers = #tpu.dot_dimension_numbers<[1], [0], [0], [1], [0, 0, 1, 1], [], []>} : vector<2x256xf32>, vector<256x128xf32>, vector<2x128xf32> -> vector<2x128xf32>
    %11 = vector.broadcast %9 : vector<1x128xf32> to vector<2x128xf32>
    %12 = arith.addf %10, %11 : vector<2x128xf32>
    %cst_11 = arith.constant 0.000000e+00 : f32
    %13 = vector.broadcast %cst_11 : f32 to vector<2x128xf32>
    %14 = arith.maximumf %12, %13 : vector<2x128xf32>
    %c0_12 = arith.constant 0 : index
    %c0_13 = arith.constant 0 : index
    %15 = vector.load %arg5[%c0_12, %c0_13] : memref<128x128xf32, #tpu.memory_space<vmem>>, vector<128x128xf32>
    %c0_14 = arith.constant 0 : index
    %c0_15 = arith.constant 0 : index
    %16 = vector.load %arg6[%c0_14, %c0_15] : memref<1x128xf32, #tpu.memory_space<vmem>>, vector<1x128xf32>
    %cst_16 = arith.constant dense<0.000000e+00> : vector<2x128xf32>
    %17 = tpu.matmul %14, %15, %cst_16 {dimension_numbers = #tpu.dot_dimension_numbers<[1], [0], [0], [1], [0, 0, 1, 1], [], []>} : vector<2x128xf32>, vector<128x128xf32>, vector<2x128xf32> -> vector<2x128xf32>
    %18 = vector.broadcast %16 : vector<1x128xf32> to vector<2x128xf32>
    %19 = arith.addf %17, %18 : vector<2x128xf32>
    %cst_17 = arith.constant 0.000000e+00 : f32
    %20 = vector.broadcast %cst_17 : f32 to vector<2x128xf32>
    %21 = arith.maximumf %19, %20 : vector<2x128xf32>
    %c0_18 = arith.constant 0 : index
    %c0_19 = arith.constant 0 : index
    %22 = vector.load %arg7[%c0_18, %c0_19] : memref<128x128xf32, #tpu.memory_space<vmem>>, vector<128x128xf32>
    %c0_20 = arith.constant 0 : index
    %c0_21 = arith.constant 0 : index
    %23 = vector.load %arg8[%c0_20, %c0_21] : memref<1x128xf32, #tpu.memory_space<vmem>>, vector<1x128xf32>
    %cst_22 = arith.constant dense<0.000000e+00> : vector<2x128xf32>
    %24 = tpu.matmul %21, %22, %cst_22 {dimension_numbers = #tpu.dot_dimension_numbers<[1], [0], [0], [1], [0, 0, 1, 1], [], []>} : vector<2x128xf32>, vector<128x128xf32>, vector<2x128xf32> -> vector<2x128xf32>
    %25 = vector.broadcast %23 : vector<1x128xf32> to vector<2x128xf32>
    %26 = arith.addf %24, %25 : vector<2x128xf32>
    %cst_23 = arith.constant 0.000000e+00 : f32
    %27 = vector.broadcast %cst_23 : f32 to vector<2x128xf32>
    %28 = arith.maximumf %26, %27 : vector<2x128xf32>
    %c0_24 = arith.constant 0 : index
    %c0_25 = arith.constant 0 : index
    %29 = vector.load %arg9[%c0_24, %c0_25] : memref<128x128xf32, #tpu.memory_space<vmem>>, vector<128x128xf32>
    %c0_26 = arith.constant 0 : index
    %c0_27 = arith.constant 0 : index
    %30 = vector.load %arg10[%c0_26, %c0_27] : memref<1x128xf32, #tpu.memory_space<vmem>>, vector<1x128xf32>
    %cst_28 = arith.constant dense<0.000000e+00> : vector<2x128xf32>
    %31 = tpu.matmul %28, %29, %cst_28 {dimension_numbers = #tpu.dot_dimension_numbers<[1], [0], [0], [1], [0, 0, 1, 1], [], []>} : vector<2x128xf32>, vector<128x128xf32>, vector<2x128xf32> -> vector<2x128xf32>
    %32 = vector.broadcast %30 : vector<1x128xf32> to vector<2x128xf32>
    %33 = arith.addf %31, %32 : vector<2x128xf32>
    %c0_29 = arith.constant 0 : index
    %c0_30 = arith.constant 0 : index
    %34 = vector.load %arg11[%c0_29, %c0_30] : memref<2x128xf32, #tpu.memory_space<vmem>>, vector<2x128xf32>
    tpu.vector_store %arg11[%c0_29, %c0_30], %33 {strides = array<i32>} : memref<2x128xf32, #tpu.memory_space<vmem>>, vector<2x128xf32>,
    return
  }
}

</mosaic_0001>

<bundles_post_ra>
// kernel: _lambda_.3
= control target key start
LH: loop header
LB: loop body
LE: loop exit
PB: predicated region body
PF: predicated region fallthrough
CT: control target
= control target key end

     0   :  { %vm89_vm0 = vcmask 261120   ;;  %s1597_s1 = inlined_call_operand.vmem [shape: f32[32,128], index: 1, kind: input, shape index: {}]   ;;  %s1598_s0 = inlined_call_operand.vmem [shape: f32[512,32], index: 0, kind: input, shape index: {}]   ;;  %s1599_s2 = inlined_call_operand.vmem [shape: f32[1,128], index: 2, kind: input, shape index: {}]   ;;  %s1600_s3 = inlined_call_operand.vmem [shape: f32[512,128], index: 3, kind: output, shape index: {}]  }
   0x1   :  { %v78_v0 = vld [vmem:[%s1597_s1] sm:$0xff]  ;;  %v79_v1 = vld [vmem:[%s1597_s1 + $0x8] sm:$0xff]  ;;  %v80_v2 = vld [vmem:[%s1597_s1 + $0x10] sm:$0xff] }
   0x2   :  { %v1036_v3 = vpack.c.bf16 %v79_v1, %v78_v0  ;;  %v81_v4 = vld [vmem:[%s1597_s1 + $0x18] sm:$0xff]  ;;  %v14_v5 = vld [vmem:[%s1598_s0] sm:$0xff]  ;;  %v15_v8 = vld [vmem:[%s1598_s0 + $0x8] sm:$0xff] }
   0x3   :  { %v46_v6 = vld [vmem:[%s1598_s0 + $0x100] sm:$0xff]  ;;  %v1040_v7 = vpack.c.bf16 %v81_v4, %v80_v2  ;;  %940 = vmatprep.mubr.msk.f32.mxu0 %vm89_vm0, %v14_v5  ;;  %v47_v9 = vld [vmem:[%s1598_s0 + $0x108] sm:$0xff]  ;;  %v16_v10 = vld [vmem:[%s1598_s0 + $0x10] sm:$0xff] }
   0x4   :  { %988 = vmatprep.mubr.msk.f32.mxu1 %vm89_vm0, %v46_v6  ;;  %1037 = vmatprep.subr.bf16.mxu0 %v1036_v3  ;;  %v48_v11 = vld [vmem:[%s1598_s0 + $0x110] sm:$0xff]  ;;  %v17_v12 = vld [vmem:[%s1598_s0 + $0x18] sm:$0xff]  ;;  %v18_v14 = vld [vmem:[%s1598_s0 + $0x20] sm:$0xff] }
   0x5   :  { %1044 = vmatprep.subr.bf16.mxu1 %v1036_v3  ;;  %1039 = vmatpush3.bf16.msra.mxu0 %v1036_v3  ;;  %v49_v13 = vld [vmem:[%s1598_s0 + $0x118] sm:$0xff]  ;;  %v50_v15 = vld [vmem:[%s1598_s0 + $0x120] sm:$0xff]  ;;  %v19_v16 = vld [vmem:[%s1598_s0 + $0x28] sm:$0xff] }
   0x6   :  { %1046 = vmatpush3.bf16.msra.mxu1 %v1036_v3  ;;  %1041 = vmatprep.subr.bf16.mxu0 %v1040_v7  ;;  %v51_v17 = vld [vmem:[%s1598_s0 + $0x128] sm:$0xff]  ;;  %v20_v18 = vld [vmem:[%s1598_s0 + $0x30] sm:$0xff]  ;;  %v21_v20 = vld [vmem:[%s1598_s0 + $0x38] sm:$0xff] }
   0x7   :  { %1045 = vmatprep.subr.bf16.mxu1 %v1040_v7  ;;  %v52_v19 = vld [vmem:[%s1598_s0 + $0x130] sm:$0xff]  ;;  %v53_v21 = vld [vmem:[%s1598_s0 + $0x138] sm:$0xff]  ;;  %v22_v22 = vld [vmem:[%s1598_s0 + $0x40] sm:$0xff] }
   0x8   :  { %v54_v23 = vld [vmem:[%s1598_s0 + $0x140] sm:$0xff]  ;;  %v23_v24 = vld [vmem:[%s1598_s0 + $0x48] sm:$0xff]  ;;  %v24_v26 = vld [vmem:[%s1598_s0 + $0x50] sm:$0xff] }
   0x9   :  { %1043 = vmatpush3.bf16.msra.mxu0 %v1040_v7  ;;  %v55_v25 = vld [vmem:[%s1598_s0 + $0x148] sm:$0xff]  ;;  %v56_v27 = vld [vmem:[%s1598_s0 + $0x150] sm:$0xff]  ;;  %v25_v28 = vld [vmem:[%s1598_s0 + $0x58] sm:$0xff] }
   0xa   :  { %1047 = vmatpush3.bf16.msra.mxu1 %v1040_v7  ;;  %v57_v29 = vld [vmem:[%s1598_s0 + $0x158] sm:$0xff]  ;;  %v26_v30 = vld [vmem:[%s1598_s0 + $0x60] sm:$0xff]  ;;  %v27_v32 = vld [vmem:[%s1598_s0 + $0x68] sm:$0xff] }
   0xb   :  { %v58_v31 = vld [vmem:[%s1598_s0 + $0x160] sm:$0xff]  ;;  %v59_v33 = vld [vmem:[%s1598_s0 + $0x168] sm:$0xff]  ;;  %v28_v34 = vld [vmem:[%s1598_s0 + $0x70] sm:$0xff] }
   0xc   :  { %941 = vmatmul.mubr.msk.f32.vlgmr.msra.gmra.mrb[0].mxu0 %vm89_vm0, %v15_v8  ;;  %v60_v35 = vld [vmem:[%s1598_s0 + $0x170] sm:$0xff]  ;;  %v29_v36 = vld [vmem:[%s1598_s0 + $0x78] sm:$0xff]  ;;  %v30_v38 = vld [vmem:[%s1598_s0 + $0x80] sm:$0xff] }
   0xd   :  { %989 = vmatmul.mubr.msk.f32.vlgmr.msra.gmra.mrb[0].mxu1 %vm89_vm0, %v47_v9  ;;  %943 = vmatprep.mubr.msk.f32.mxu0 %vm89_vm0, %v16_v10  ;;  %v61_v37 = vld [vmem:[%s1598_s0 + $0x178] sm:$0xff]  ;;  %v62_v39 = vld [vmem:[%s1598_s0 + $0x180] sm:$0xff]  ;;  %v31_v40 = vld [vmem:[%s1598_s0 + $0x88] sm:$0xff] }
   0xe   :  { %991 = vmatprep.mubr.msk.f32.mxu1 %vm89_vm0, %v48_v11  ;;  %v63_v41 = vld [vmem:[%s1598_s0 + $0x188] sm:$0xff]  ;;  %v32_v42 = vld [vmem:[%s1598_s0 + $0x90] sm:$0xff]  ;;  %v33_v44 = vld [vmem:[%s1598_s0 + $0x98] sm:$0xff] }
   0xf   :  { %v64_v43 = vld [vmem:[%s1598_s0 + $0x190] sm:$0xff]  ;;  %v65_v45 = vld [vmem:[%s1598_s0 + $0x198] sm:$0xff]  ;;  %v34_v46 = vld [vmem:[%s1598_s0 + $0xa0] sm:$0xff] }
  0x10   :  { %944 = vmatmul.mubr.msk.f32.gmra.mrb[2].mxu0 %vm89_vm0, %v17_v12  ;;  %v66_v47 = vld [vmem:[%s1598_s0 + $0x1a0] sm:$0xff]  ;;  %v35_v48 = vld [vmem:[%s1598_s0 + $0xa8] sm:$0xff]  ;;  %v36_v50 = vld [vmem:[%s1598_s0 + $0xb0] sm:$0xff] }
  0x11   :  { %992 = vmatmul.mubr.msk.f32.gmra.mrb[2].mxu1 %vm89_vm0, %v49_v13  ;;  %946 = vmatprep.mubr.msk.f32.mxu0 %vm89_vm0, %v18_v14  ;;  %v67_v49 = vld [vmem:[%s1598_s0 + $0x1a8] sm:$0xff]  ;;  %v68_v51 = vld [vmem:[%s1598_s0 + $0x1b0] sm:$0xff]  ;;  %v37_v52 = vld [vmem:[%s1598_s0 + $0xb8] sm:$0xff] }
  0x12   :  { %994 = vmatprep.mubr.msk.f32.mxu1 %vm89_vm0, %v50_v15  ;;  %v69_v53 = vld [vmem:[%s1598_s0 + $0x1b8] sm:$0xff]  ;;  %v38_v54 = vld [vmem:[%s1598_s0 + $0xc0] sm:$0xff]  ;;  %v39_v56 = vld [vmem:[%s1598_s0 + $0xc8] sm:$0xff] }
  0x13   :  { %v70_v55 = vld [vmem:[%s1598_s0 + $0x1c0] sm:$0xff]  ;;  %v71_v57 = vld [vmem:[%s1598_s0 + $0x1c8] sm:$0xff]  ;;  %v40_v58 = vld [vmem:[%s1598_s0 + $0xd0] sm:$0xff] }
  0x14   :  { %947 = vmatmul.mubr.msk.f32.gmra.mrb[4].mxu0 %vm89_vm0, %v19_v16  ;;  %v72_v59 = vld [vmem:[%s1598_s0 + $0x1d0] sm:$0xff]  ;;  %v41_v60 = vld [vmem:[%s1598_s0 + $0xd8] sm:$0xff]  ;;  %v42_v62 = vld [vmem:[%s1598_s0 + $0xe0] sm:$0xff] }
  0x15   :  { %995 = vmatmul.mubr.msk.f32.gmra.mrb[4].mxu1 %vm89_vm0, %v51_v17  ;;  %949 = vmatprep.mubr.msk.f32.mxu0 %vm89_vm0, %v20_v18  ;;  %v73_v61 = vld [vmem:[%s1598_s0 + $0x1d8] sm:$0xff]  ;;  %v74_v63 = vld [vmem:[%s1598_s0 + $0x1e0] sm:$0xff]  ;;  %v43_v0 = vld [vmem:[%s1598_s0 + $0xe8] sm:$0xff] }
  0x16   :  { %997 = vmatprep.mubr.msk.f32.mxu1 %vm89_vm0, %v52_v19  ;;  %v75_v1 = vld [vmem:[%s1598_s0 + $0x1e8] sm:$0xff]  ;;  %v44_v2 = vld [vmem:[%s1598_s0 + $0xf0] sm:$0xff]  ;;  %v45_v4 = vld [vmem:[%s1598_s0 + $0xf8] sm:$0xff] }
  0x17   :  { %v76_v3 = vld [vmem:[%s1598_s0 + $0x1f0] sm:$0xff]  ;;  %v77_v5 = vld [vmem:[%s1598_s0 + $0x1f8] sm:$0xff]  ;;  %v1339_v6 = vld [vmem:[%s1599_s2] ss:$0 sm:$0xff] }
  0x18   :  { %950 = vmatmul.mubr.msk.f32.gmra.mrb[6].mxu0 %vm89_vm0, %v21_v20 }
  0x19   :  { %998 = vmatmul.mubr.msk.f32.gmra.mrb[6].mxu1 %vm89_vm0, %v53_v21  ;;  %952 = vmatprep.mubr.msk.f32.mxu0 %vm89_vm0, %v22_v22 }
  0x1a   :  { %1000 = vmatprep.mubr.msk.f32.mxu1 %vm89_vm0, %v54_v23 }
  0x1c   :  { %953 = vmatmul.mubr.msk.f32.gmra.mrb[8].mxu0 %vm89_vm0, %v23_v24 }
  0x1d   :  { %1001 = vmatmul.mubr.msk.f32.gmra.mrb[8].mxu1 %vm89_vm0, %v55_v25  ;;  %955 = vmatprep.mubr.msk.f32.mxu0 %vm89_vm0, %v24_v26 }
  0x1e   :  { %1003 = vmatprep.mubr.msk.f32.mxu1 %vm89_vm0, %v56_v27 }
  0x20   :  { %956 = vmatmul.mubr.msk.f32.gmra.mrb[10].mxu0 %vm89_vm0, %v25_v28 }
  0x21   :  { %1004 = vmatmul.mubr.msk.f32.gmra.mrb[10].mxu1 %vm89_vm0, %v57_v29  ;;  %958 = vmatprep.mubr.msk.f32.mxu0 %vm89_vm0, %v26_v30 }
  0x22   :  { %1006 = vmatprep.mubr.msk.f32.mxu1 %vm89_vm0, %v58_v31 }
  0x24   :  { %959 = vmatmul.mubr.msk.f32.gmra.mrb[12].mxu0 %vm89_vm0, %v27_v32 }
  0x25   :  { %1007 = vmatmul.mubr.msk.f32.gmra.mrb[12].mxu1 %vm89_vm0, %v59_v33  ;;  %961 = vmatprep.mubr.msk.f32.mxu0 %vm89_vm0, %v28_v34 }
  0x26   :  { %1009 = vmatprep.mubr.msk.f32.mxu1 %vm89_vm0, %v60_v35 }
  0x28   :  { %962 = vmatmul.mubr.msk.f32.gmra.mrb[14].mxu0 %vm89_vm0, %v29_v36 }
  0x29   :  { %1010 = vmatmul.mubr.msk.f32.gmra.mrb[14].mxu1 %vm89_vm0, %v61_v37  ;;  %964 = vmatprep.mubr.msk.f32.mxu0 %vm89_vm0, %v30_v38 }
  0x2a   :  { %1012 = vmatprep.mubr.msk.f32.mxu1 %vm89_vm0, %v62_v39 }
  0x2c   :  { %965 = vmatmul.mubr.msk.f32.gmra.mrb[16].mxu0 %vm89_vm0, %v31_v40 }
  0x2d   :  { %1013 = vmatmul.mubr.msk.f32.gmra.mrb[16].mxu1 %vm89_vm0, %v63_v41  ;;  %967 = vmatprep.mubr.msk.f32.mxu0 %vm89_vm0, %v32_v42 }
  0x2e   :  { %1015 = vmatprep.mubr.msk.f32.mxu1 %vm89_vm0, %v64_v43 }
  0x30   :  { %968 = vmatmul.mubr.msk.f32.gmra.mrb[18].mxu0 %vm89_vm0, %v33_v44 }
  0x31   :  { %1016 = vmatmul.mubr.msk.f32.gmra.mrb[18].mxu1 %vm89_vm0, %v65_v45  ;;  %970 = vmatprep.mubr.msk.f32.mxu0 %vm89_vm0, %v34_v46 }
  0x32   :  { %1018 = vmatprep.mubr.msk.f32.mxu1 %vm89_vm0, %v66_v47 }
  0x34   :  { %971 = vmatmul.mubr.msk.f32.gmra.mrb[20].mxu0 %vm89_vm0, %v35_v48 }
  0x35   :  { %1019 = vmatmul.mubr.msk.f32.gmra.mrb[20].mxu1 %vm89_vm0, %v67_v49  ;;  %973 = vmatprep.mubr.msk.f32.mxu0 %vm89_vm0, %v36_v50 }
  0x36   :  { %1021 = vmatprep.mubr.msk.f32.mxu1 %vm89_vm0, %v68_v51 }
  0x38   :  { %974 = vmatmul.mubr.msk.f32.gmra.mrb[22].mxu0 %vm89_vm0, %v37_v52 }
  0x39   :  { %1022 = vmatmul.mubr.msk.f32.gmra.mrb[22].mxu1 %vm89_vm0, %v69_v53  ;;  %976 = vmatprep.mubr.msk.f32.mxu0 %vm89_vm0, %v38_v54 }
  0x3a   :  { %1024 = vmatprep.mubr.msk.f32.mxu1 %vm89_vm0, %v70_v55 }
  0x3c   :  { %977 = vmatmul.mubr.msk.f32.gmra.mrb[24].mxu0 %vm89_vm0, %v39_v56 }
  0x3d   :  { %1025 = vmatmul.mubr.msk.f32.gmra.mrb[24].mxu1 %vm89_vm0, %v71_v57  ;;  %979 = vmatprep.mubr.msk.f32.mxu0 %vm89_vm0, %v40_v58 }
  0x3e   :  { %1027 = vmatprep.mubr.msk.f32.mxu1 %vm89_vm0, %v72_v59 }
  0x40   :  { %980 = vmatmul.mubr.msk.f32.gmra.mrb[26].mxu0 %vm89_vm0, %v41_v60 }
  0x41   :  { %1028 = vmatmul.mubr.msk.f32.gmra.mrb[26].mxu1 %vm89_vm0, %v73_v61  ;;  %982 = vmatprep.mubr.msk.f32.mxu0 %vm89_vm0, %v42_v62 }
  0x42   :  { %1030 = vmatprep.mubr.msk.f32.mxu1 %vm89_vm0, %v74_v63 }
  0x44   :  { %983 = vmatmul.mubr.msk.f32.gmra.mrb[28].mxu0 %vm89_vm0, %v43_v0 }
  0x45   :  { %1031 = vmatmul.mubr.msk.f32.gmra.mrb[28].mxu1 %vm89_vm0, %v75_v1  ;;  %985 = vmatprep.mubr.msk.f32.mxu0 %vm89_vm0, %v44_v2 }
  0x46   :  { %1033 = vmatprep.mubr.msk.f32.mxu1 %vm89_vm0, %v76_v3 }
  0x48   :  { %986 = vmatmul.mubr.msk.f32.gmra.mrb[30].mxu0 %vm89_vm0, %v45_v4 }
  0x49   :  { %1034 = vmatmul.mubr.msk.f32.gmra.mrb[30].mxu1 %vm89_vm0, %v77_v5 }
  0xdf   :  { %v942_v7 = vpop.f32.mrb[0].mxu0 }
  0xe0   :  { %v990_v8 = vpop.f32.mrb[0].mxu1  ;;  %v354_v9 = vadd.f32 %v942_v7, %v1339_v6  ;;  %v348_v11 = vpop.f32.mrb[1].mxu0 }
  0xe1   :  { %v514_v10 = vadd.f32 %v990_v8, %v1339_v6  ;;  %v508_v12 = vpop.f32.mrb[1].mxu1  ;;  %v349_v13 = vadd.f32 %v1339_v6, %v348_v11 }
  0xe2   :  { %v509_v14 = vadd.f32 %v1339_v6, %v508_v12  ;;  %v668_v15 = vmax.f32 %v354_v9, 0.0 }
  0xe3   :  { %v700_v16 = vmax.f32 %v514_v10, 0.0  ;;  %v667_v17 = vmax.f32 %v349_v13, 0.0  ;;  %v945_v19 = vpop.f32.mrb[2].mxu0 }
  0xe4   :  { %v699_v18 = vmax.f32 %v509_v14, 0.0  ;;  %v993_v20 = vpop.f32.mrb[2].mxu1  ;;  %732 = vst [vmem:[%s1600_s3 + $0x8] sm:$0xff] %v668_v15  ;;  %v364_v21 = vadd.f32 %v945_v19, %v1339_v6  ;;  %v358_v23 = vpop.f32.mrb[3].mxu0 }
  0xe5   :  { %764 = vst [vmem:[%s1600_s3 + $0x108] sm:$0xff] %v700_v16  ;;  %v524_v22 = vadd.f32 %v993_v20, %v1339_v6  ;;  %v518_v24 = vpop.f32.mrb[3].mxu1  ;;  %731 = vst [vmem:[%s1600_s3] sm:$0xff] %v667_v17  ;;  %v359_v25 = vadd.f32 %v1339_v6, %v358_v23 }
  0xe6   :  { %763 = vst [vmem:[%s1600_s3 + $0x100] sm:$0xff] %v699_v18  ;;  %v519_v26 = vadd.f32 %v1339_v6, %v518_v24  ;;  %v670_v27 = vmax.f32 %v364_v21, 0.0 }
  0xe7   :  { %v702_v28 = vmax.f32 %v524_v22, 0.0  ;;  %v669_v29 = vmax.f32 %v359_v25, 0.0  ;;  %v948_v31 = vpop.f32.mrb[4].mxu0 }
  0xe8   :  { %v701_v30 = vmax.f32 %v519_v26, 0.0  ;;  %v996_v32 = vpop.f32.mrb[4].mxu1  ;;  %734 = vst [vmem:[%s1600_s3 + $0x18] sm:$0xff] %v670_v27  ;;  %v374_v33 = vadd.f32 %v948_v31, %v1339_v6  ;;  %v368_v35 = vpop.f32.mrb[5].mxu0 }
  0xe9   :  { %766 = vst [vmem:[%s1600_s3 + $0x118] sm:$0xff] %v702_v28  ;;  %v534_v34 = vadd.f32 %v996_v32, %v1339_v6  ;;  %v528_v36 = vpop.f32.mrb[5].mxu1  ;;  %733 = vst [vmem:[%s1600_s3 + $0x10] sm:$0xff] %v669_v29  ;;  %v369_v37 = vadd.f32 %v1339_v6, %v368_v35 }
  0xea   :  { %765 = vst [vmem:[%s1600_s3 + $0x110] sm:$0xff] %v701_v30  ;;  %v529_v38 = vadd.f32 %v1339_v6, %v528_v36  ;;  %v672_v39 = vmax.f32 %v374_v33, 0.0 }
  0xeb   :  { %v704_v40 = vmax.f32 %v534_v34, 0.0  ;;  %v671_v41 = vmax.f32 %v369_v37, 0.0  ;;  %v951_v43 = vpop.f32.mrb[6].mxu0 }
  0xec   :  { %v703_v42 = vmax.f32 %v529_v38, 0.0  ;;  %v999_v44 = vpop.f32.mrb[6].mxu1  ;;  %736 = vst [vmem:[%s1600_s3 + $0x28] sm:$0xff] %v672_v39  ;;  %v384_v45 = vadd.f32 %v951_v43, %v1339_v6  ;;  %v378_v47 = vpop.f32.mrb[7].mxu0 }
  0xed   :  { %768 = vst [vmem:[%s1600_s3 + $0x128] sm:$0xff] %v704_v40  ;;  %v544_v46 = vadd.f32 %v999_v44, %v1339_v6  ;;  %v538_v48 = vpop.f32.mrb[7].mxu1  ;;  %735 = vst [vmem:[%s1600_s3 + $0x20] sm:$0xff] %v671_v41  ;;  %v379_v49 = vadd.f32 %v1339_v6, %v378_v47 }
  0xee   :  { %767 = vst [vmem:[%s1600_s3 + $0x120] sm:$0xff] %v703_v42  ;;  %v539_v50 = vadd.f32 %v1339_v6, %v538_v48  ;;  %v674_v51 = vmax.f32 %v384_v45, 0.0 }
  0xef   :  { %v706_v52 = vmax.f32 %v544_v46, 0.0  ;;  %v673_v53 = vmax.f32 %v379_v49, 0.0  ;;  %v954_v55 = vpop.f32.mrb[8].mxu0 }
  0xf0   :  { %v705_v54 = vmax.f32 %v539_v50, 0.0  ;;  %v1002_v56 = vpop.f32.mrb[8].mxu1  ;;  %738 = vst [vmem:[%s1600_s3 + $0x38] sm:$0xff] %v674_v51  ;;  %v394_v57 = vadd.f32 %v954_v55, %v1339_v6  ;;  %v388_v59 = vpop.f32.mrb[9].mxu0 }
  0xf1   :  { %770 = vst [vmem:[%s1600_s3 + $0x138] sm:$0xff] %v706_v52  ;;  %v554_v58 = vadd.f32 %v1002_v56, %v1339_v6  ;;  %v548_v60 = vpop.f32.mrb[9].mxu1  ;;  %737 = vst [vmem:[%s1600_s3 + $0x30] sm:$0xff] %v673_v53  ;;  %v389_v61 = vadd.f32 %v1339_v6, %v388_v59 }
  0xf2   :  { %769 = vst [vmem:[%s1600_s3 + $0x130] sm:$0xff] %v705_v54  ;;  %v549_v62 = vadd.f32 %v1339_v6, %v548_v60  ;;  %v676_v63 = vmax.f32 %v394_v57, 0.0 }
  0xf3   :  { %v708_v0 = vmax.f32 %v554_v58, 0.0  ;;  %v675_v1 = vmax.f32 %v389_v61, 0.0  ;;  %v957_v3 = vpop.f32.mrb[10].mxu0 }
  0xf4   :  { %v707_v2 = vmax.f32 %v549_v62, 0.0  ;;  %v1005_v4 = vpop.f32.mrb[10].mxu1  ;;  %740 = vst [vmem:[%s1600_s3 + $0x48] sm:$0xff] %v676_v63  ;;  %v404_v5 = vadd.f32 %v957_v3, %v1339_v6  ;;  %v398_v8 = vpop.f32.mrb[11].mxu0 }
  0xf5   :  { %772 = vst [vmem:[%s1600_s3 + $0x148] sm:$0xff] %v708_v0  ;;  %v564_v7 = vadd.f32 %v1005_v4, %v1339_v6  ;;  %v558_v9 = vpop.f32.mrb[11].mxu1  ;;  %739 = vst [vmem:[%s1600_s3 + $0x40] sm:$0xff] %v675_v1  ;;  %v399_v10 = vadd.f32 %v1339_v6, %v398_v8 }
  0xf6   :  { %771 = vst [vmem:[%s1600_s3 + $0x140] sm:$0xff] %v707_v2  ;;  %v559_v11 = vadd.f32 %v1339_v6, %v558_v9  ;;  %v678_v12 = vmax.f32 %v404_v5, 0.0 }
  0xf7   :  { %v710_v13 = vmax.f32 %v564_v7, 0.0  ;;  %v677_v14 = vmax.f32 %v399_v10, 0.0  ;;  %v960_v16 = vpop.f32.mrb[12].mxu0 }
  0xf8   :  { %v709_v15 = vmax.f32 %v559_v11, 0.0  ;;  %v1008_v17 = vpop.f32.mrb[12].mxu1  ;;  %742 = vst [vmem:[%s1600_s3 + $0x58] sm:$0xff] %v678_v12  ;;  %v414_v18 = vadd.f32 %v960_v16, %v1339_v6  ;;  %v408_v20 = vpop.f32.mrb[13].mxu0 }
  0xf9   :  { %774 = vst [vmem:[%s1600_s3 + $0x158] sm:$0xff] %v710_v13  ;;  %v574_v19 = vadd.f32 %v1008_v17, %v1339_v6  ;;  %v568_v21 = vpop.f32.mrb[13].mxu1  ;;  %741 = vst [vmem:[%s1600_s3 + $0x50] sm:$0xff] %v677_v14  ;;  %v409_v22 = vadd.f32 %v1339_v6, %v408_v20 }
  0xfa   :  { %773 = vst [vmem:[%s1600_s3 + $0x150] sm:$0xff] %v709_v15  ;;  %v569_v23 = vadd.f32 %v1339_v6, %v568_v21  ;;  %v680_v24 = vmax.f32 %v414_v18, 0.0 }
  0xfb   :  { %v712_v25 = vmax.f32 %v574_v19, 0.0  ;;  %v679_v26 = vmax.f32 %v409_v22, 0.0  ;;  %v963_v28 = vpop.f32.mrb[14].mxu0 }
  0xfc   :  { %v711_v27 = vmax.f32 %v569_v23, 0.0  ;;  %v1011_v29 = vpop.f32.mrb[14].mxu1  ;;  %744 = vst [vmem:[%s1600_s3 + $0x68] sm:$0xff] %v680_v24  ;;  %v424_v30 = vadd.f32 %v963_v28, %v1339_v6  ;;  %v418_v32 = vpop.f32.mrb[15].mxu0 }
  0xfd   :  { %776 = vst [vmem:[%s1600_s3 + $0x168] sm:$0xff] %v712_v25  ;;  %v584_v31 = vadd.f32 %v1011_v29, %v1339_v6  ;;  %v578_v33 = vpop.f32.mrb[15].mxu1  ;;  %743 = vst [vmem:[%s1600_s3 + $0x60] sm:$0xff] %v679_v26  ;;  %v419_v34 = vadd.f32 %v1339_v6, %v418_v32 }
  0xfe   :  { %775 = vst [vmem:[%s1600_s3 + $0x160] sm:$0xff] %v711_v27  ;;  %v579_v35 = vadd.f32 %v1339_v6, %v578_v33  ;;  %v682_v36 = vmax.f32 %v424_v30, 0.0 }
  0xff   :  { %v714_v37 = vmax.f32 %v584_v31, 0.0  ;;  %v681_v38 = vmax.f32 %v419_v34, 0.0  ;;  %v966_v40 = vpop.f32.mrb[16].mxu0 }
 0x100   :  { %v713_v39 = vmax.f32 %v579_v35, 0.0  ;;  %v1014_v41 = vpop.f32.mrb[16].mxu1  ;;  %746 = vst [vmem:[%s1600_s3 + $0x78] sm:$0xff] %v682_v36  ;;  %v434_v42 = vadd.f32 %v966_v40, %v1339_v6  ;;  %v428_v44 = vpop.f32.mrb[17].mxu0 }
 0x101   :  { %778 = vst [vmem:[%s1600_s3 + $0x178] sm:$0xff] %v714_v37  ;;  %v594_v43 = vadd.f32 %v1014_v41, %v1339_v6  ;;  %v588_v45 = vpop.f32.mrb[17].mxu1  ;;  %745 = vst [vmem:[%s1600_s3 + $0x70] sm:$0xff] %v681_v38  ;;  %v429_v46 = vadd.f32 %v1339_v6, %v428_v44 }
 0x102   :  { %777 = vst [vmem:[%s1600_s3 + $0x170] sm:$0xff] %v713_v39  ;;  %v589_v47 = vadd.f32 %v1339_v6, %v588_v45  ;;  %v684_v48 = vmax.f32 %v434_v42, 0.0 }
 0x103   :  { %v716_v49 = vmax.f32 %v594_v43, 0.0  ;;  %v683_v50 = vmax.f32 %v429_v46, 0.0  ;;  %v969_v52 = vpop.f32.mrb[18].mxu0 }
 0x104   :  { %v715_v51 = vmax.f32 %v589_v47, 0.0  ;;  %v1017_v53 = vpop.f32.mrb[18].mxu1  ;;  %748 = vst [vmem:[%s1600_s3 + $0x88] sm:$0xff] %v684_v48  ;;  %v444_v54 = vadd.f32 %v969_v52, %v1339_v6  ;;  %v438_v56 = vpop.f32.mrb[19].mxu0 }
 0x105   :  { %780 = vst [vmem:[%s1600_s3 + $0x188] sm:$0xff] %v716_v49  ;;  %v604_v55 = vadd.f32 %v1017_v53, %v1339_v6  ;;  %v598_v57 = vpop.f32.mrb[19].mxu1  ;;  %747 = vst [vmem:[%s1600_s3 + $0x80] sm:$0xff] %v683_v50  ;;  %v439_v58 = vadd.f32 %v1339_v6, %v438_v56 }
 0x106   :  { %779 = vst [vmem:[%s1600_s3 + $0x180] sm:$0xff] %v715_v51  ;;  %v599_v59 = vadd.f32 %v1339_v6, %v598_v57  ;;  %v686_v60 = vmax.f32 %v444_v54, 0.0 }
 0x107   :  { %v718_v61 = vmax.f32 %v604_v55, 0.0  ;;  %v685_v62 = vmax.f32 %v439_v58, 0.0  ;;  %v972_v0 = vpop.f32.mrb[20].mxu0 }
 0x108   :  { %v717_v63 = vmax.f32 %v599_v59, 0.0  ;;  %v1020_v1 = vpop.f32.mrb[20].mxu1  ;;  %750 = vst [vmem:[%s1600_s3 + $0x98] sm:$0xff] %v686_v60  ;;  %v454_v2 = vadd.f32 %v972_v0, %v1339_v6  ;;  %v448_v4 = vpop.f32.mrb[21].mxu0 }
 0x109   :  { %782 = vst [vmem:[%s1600_s3 + $0x198] sm:$0xff] %v718_v61  ;;  %v614_v3 = vadd.f32 %v1020_v1, %v1339_v6  ;;  %v608_v5 = vpop.f32.mrb[21].mxu1  ;;  %749 = vst [vmem:[%s1600_s3 + $0x90] sm:$0xff] %v685_v62  ;;  %v449_v7 = vadd.f32 %v1339_v6, %v448_v4 }
 0x10a   :  { %781 = vst [vmem:[%s1600_s3 + $0x190] sm:$0xff] %v717_v63  ;;  %v609_v8 = vadd.f32 %v1339_v6, %v608_v5  ;;  %v688_v9 = vmax.f32 %v454_v2, 0.0 }
 0x10b   :  { %v720_v10 = vmax.f32 %v614_v3, 0.0  ;;  %v687_v11 = vmax.f32 %v449_v7, 0.0  ;;  %v975_v13 = vpop.f32.mrb[22].mxu0 }
 0x10c   :  { %v719_v12 = vmax.f32 %v609_v8, 0.0  ;;  %v1023_v14 = vpop.f32.mrb[22].mxu1  ;;  %752 = vst [vmem:[%s1600_s3 + $0xa8] sm:$0xff] %v688_v9  ;;  %v464_v15 = vadd.f32 %v975_v13, %v1339_v6  ;;  %v458_v17 = vpop.f32.mrb[23].mxu0 }
 0x10d   :  { %784 = vst [vmem:[%s1600_s3 + $0x1a8] sm:$0xff] %v720_v10  ;;  %v624_v16 = vadd.f32 %v1023_v14, %v1339_v6  ;;  %v618_v18 = vpop.f32.mrb[23].mxu1  ;;  %751 = vst [vmem:[%s1600_s3 + $0xa0] sm:$0xff] %v687_v11  ;;  %v459_v19 = vadd.f32 %v1339_v6, %v458_v17 }
 0x10e   :  { %783 = vst [vmem:[%s1600_s3 + $0x1a0] sm:$0xff] %v719_v12  ;;  %v619_v20 = vadd.f32 %v1339_v6, %v618_v18  ;;  %v690_v21 = vmax.f32 %v464_v15, 0.0 }
 0x10f   :  { %v722_v22 = vmax.f32 %v624_v16, 0.0  ;;  %v689_v23 = vmax.f32 %v459_v19, 0.0  ;;  %v978_v25 = vpop.f32.mrb[24].mxu0 }
 0x110   :  { %v721_v24 = vmax.f32 %v619_v20, 0.0  ;;  %v1026_v26 = vpop.f32.mrb[24].mxu1  ;;  %754 = vst [vmem:[%s1600_s3 + $0xb8] sm:$0xff] %v690_v21  ;;  %v474_v27 = vadd.f32 %v978_v25, %v1339_v6  ;;  %v468_v29 = vpop.f32.mrb[25].mxu0 }
 0x111   :  { %786 = vst [vmem:[%s1600_s3 + $0x1b8] sm:$0xff] %v722_v22  ;;  %v634_v28 = vadd.f32 %v1026_v26, %v1339_v6  ;;  %v628_v30 = vpop.f32.mrb[25].mxu1  ;;  %753 = vst [vmem:[%s1600_s3 + $0xb0] sm:$0xff] %v689_v23  ;;  %v469_v31 = vadd.f32 %v1339_v6, %v468_v29 }
 0x112   :  { %785 = vst [vmem:[%s1600_s3 + $0x1b0] sm:$0xff] %v721_v24  ;;  %v629_v32 = vadd.f32 %v1339_v6, %v628_v30  ;;  %v692_v33 = vmax.f32 %v474_v27, 0.0 }
 0x113   :  { %v724_v34 = vmax.f32 %v634_v28, 0.0  ;;  %v691_v35 = vmax.f32 %v469_v31, 0.0  ;;  %v981_v37 = vpop.f32.mrb[26].mxu0 }
 0x114   :  { %v723_v36 = vmax.f32 %v629_v32, 0.0  ;;  %v1029_v38 = vpop.f32.mrb[26].mxu1  ;;  %756 = vst [vmem:[%s1600_s3 + $0xc8] sm:$0xff] %v692_v33  ;;  %v484_v39 = vadd.f32 %v981_v37, %v1339_v6  ;;  %v478_v41 = vpop.f32.mrb[27].mxu0 }
 0x115   :  { %788 = vst [vmem:[%s1600_s3 + $0x1c8] sm:$0xff] %v724_v34  ;;  %v644_v40 = vadd.f32 %v1029_v38, %v1339_v6  ;;  %v638_v42 = vpop.f32.mrb[27].mxu1  ;;  %755 = vst [vmem:[%s1600_s3 + $0xc0] sm:$0xff] %v691_v35  ;;  %v479_v43 = vadd.f32 %v1339_v6, %v478_v41 }
 0x116   :  { %787 = vst [vmem:[%s1600_s3 + $0x1c0] sm:$0xff] %v723_v36  ;;  %v639_v44 = vadd.f32 %v1339_v6, %v638_v42  ;;  %v694_v45 = vmax.f32 %v484_v39, 0.0 }
 0x117   :  { %v726_v46 = vmax.f32 %v644_v40, 0.0  ;;  %v693_v47 = vmax.f32 %v479_v43, 0.0  ;;  %v984_v49 = vpop.f32.mrb[28].mxu0 }
 0x118   :  { %v725_v48 = vmax.f32 %v639_v44, 0.0  ;;  %v1032_v50 = vpop.f32.mrb[28].mxu1  ;;  %758 = vst [vmem:[%s1600_s3 + $0xd8] sm:$0xff] %v694_v45  ;;  %v494_v51 = vadd.f32 %v984_v49, %v1339_v6  ;;  %v488_v53 = vpop.f32.mrb[29].mxu0 }
 0x119   :  { %790 = vst [vmem:[%s1600_s3 + $0x1d8] sm:$0xff] %v726_v46  ;;  %v654_v52 = vadd.f32 %v1032_v50, %v1339_v6  ;;  %v648_v54 = vpop.f32.mrb[29].mxu1  ;;  %757 = vst [vmem:[%s1600_s3 + $0xd0] sm:$0xff] %v693_v47  ;;  %v489_v55 = vadd.f32 %v1339_v6, %v488_v53 }
 0x11a   :  { %789 = vst [vmem:[%s1600_s3 + $0x1d0] sm:$0xff] %v725_v48  ;;  %v649_v56 = vadd.f32 %v1339_v6, %v648_v54  ;;  %v696_v57 = vmax.f32 %v494_v51, 0.0 }
 0x11b   :  { %v728_v58 = vmax.f32 %v654_v52, 0.0  ;;  %v695_v59 = vmax.f32 %v489_v55, 0.0  ;;  %v987_v61 = vpop.f32.mrb[30].mxu0 }
 0x11c   :  { %v727_v60 = vmax.f32 %v649_v56, 0.0  ;;  %v1035_v62 = vpop.f32.mrb[30].mxu1  ;;  %760 = vst [vmem:[%s1600_s3 + $0xe8] sm:$0xff] %v696_v57  ;;  %v504_v63 = vadd.f32 %v987_v61, %v1339_v6  ;;  %v498_v1 = vpop.f32.mrb[31].mxu0 }
 0x11d   :  { %792 = vst [vmem:[%s1600_s3 + $0x1e8] sm:$0xff] %v728_v58  ;;  %v664_v0 = vadd.f32 %v1035_v62, %v1339_v6  ;;  %v658_v2 = vpop.f32.mrb[31].mxu1  ;;  %759 = vst [vmem:[%s1600_s3 + $0xe0] sm:$0xff] %v695_v59  ;;  %v499_v3 = vadd.f32 %v1339_v6, %v498_v1 }
 0x11e   :  { %791 = vst [vmem:[%s1600_s3 + $0x1e0] sm:$0xff] %v727_v60  ;;  %v659_v4 = vadd.f32 %v1339_v6, %v658_v2  ;;  %v698_v5 = vmax.f32 %v504_v63, 0.0 }
 0x11f   :  { %v730_v7 = vmax.f32 %v664_v0, 0.0  ;;  %v697_v8 = vmax.f32 %v499_v3, 0.0 }
 0x120   :  { %v729_v9 = vmax.f32 %v659_v4, 0.0  ;;  %762 = vst [vmem:[%s1600_s3 + $0xf8] sm:$0xff] %v698_v5 }
 0x121   :  { %794 = vst [vmem:[%s1600_s3 + $0x1f8] sm:$0xff] %v730_v7  ;;  %761 = vst [vmem:[%s1600_s3 + $0xf0] sm:$0xff] %v697_v8 }
 0x122   :  { %793 = vst [vmem:[%s1600_s3 + $0x1f0] sm:$0xff] %v729_v9 }

// kernel: _lambda_.4
= control target key start
LH: loop header
LB: loop body
LE: loop exit
PB: predicated region body
PF: predicated region fallthrough
CT: control target
= control target key end

     0   :  { %vm46_vm0 = vcmask 588800   ;;  %s548_s1 = inlined_call_operand.vmem [shape: f32[72,128], index: 1, kind: input, shape index: {}]   ;;  %s549_s0 = inlined_call_operand.vmem [shape: f32[128,72], index: 0, kind: input, shape index: {}]   ;;  %s550_s2 = inlined_call_operand.vmem [shape: f32[1,128], index: 2, kind: input, shape index: {}]   ;;  %s551_s3 = inlined_call_operand.vmem [shape: f32[128,128], index: 3, kind: output, shape index: {}]  }
   0x1   :  { %v30_v0 = vld [vmem:[%s548_s1] sm:$0xff]  ;;  %v31_v1 = vld [vmem:[%s548_s1 + $0x8] sm:$0xff]  ;;  %v32_v2 = vld [vmem:[%s548_s1 + $0x10] sm:$0xff] }
   0x2   :  { %v360_v3 = vpack.c.bf16 %v31_v1, %v30_v0  ;;  %v33_v4 = vld [vmem:[%s548_s1 + $0x18] sm:$0xff]  ;;  %v34_v6 = vld [vmem:[%s548_s1 + $0x20] sm:$0xff]  ;;  %v35_v7 = vld [vmem:[%s548_s1 + $0x28] sm:$0xff] }
   0x3   :  { %v364_v5 = vpack.c.bf16 %v33_v4, %v32_v2  ;;  %v14_v8 = vld [vmem:[%s549_s0] sm:$0xff]  ;;  %v368_v10 = vpack.c.bf16 %v35_v7, %v34_v6  ;;  %v36_v11 = vld [vmem:[%s548_s1 + $0x30] sm:$0xff]  ;;  %v37_v12 = vld [vmem:[%s548_s1 + $0x38] sm:$0xff] }
   0x4   :  { %361 = vmatprep.subr.bf16.mxu0 %v360_v3  ;;  %376 = vmatprep.subr.bf16.mxu1 %v360_v3  ;;  %v22_v9 = vld [vmem:[%s549_s0 + $0x40] sm:$0xff]  ;;  %v372_v13 = vpack.c.bf16 %v37_v12, %v36_v11  ;;  %v15_v15 = vld [vmem:[%s549_s0 + $0x8] sm:$0xff]  ;;  %v16_v17 = vld [vmem:[%s549_s0 + $0x10] sm:$0xff] }
   0x5   :  { %363 = vmatpush3.bf16.msra.mxu0 %v360_v3  ;;  %381 = vmatpush3.bf16.msra.mxu1 %v360_v3  ;;  %v38_v14 = vld [vmem:[%s548_s1 + $0x40] sm:$0xff]  ;;  %v23_v16 = vld [vmem:[%s549_s0 + $0x48] sm:$0xff]  ;;  %v24_v18 = vld [vmem:[%s549_s0 + $0x50] sm:$0xff] }
   0x6   :  { %365 = vmatprep.subr.bf16.mxu0 %v364_v5  ;;  %377 = vmatprep.subr.bf16.mxu1 %v364_v5  ;;  %v17_v19 = vld [vmem:[%s549_s0 + $0x18] sm:$0xff]  ;;  %v18_v21 = vld [vmem:[%s549_s0 + $0x20] sm:$0xff]  ;;  %v19_v23 = vld [vmem:[%s549_s0 + $0x28] sm:$0xff] }
   0x7   :  { %336 = vmatprep.mubr.msk.f32.mxu0 %vm46_vm0, %v14_v8  ;;  %348 = vmatprep.mubr.msk.f32.mxu1 %vm46_vm0, %v22_v9  ;;  %v25_v20 = vld [vmem:[%s549_s0 + $0x58] sm:$0xff]  ;;  %v26_v22 = vld [vmem:[%s549_s0 + $0x60] sm:$0xff]  ;;  %v27_v24 = vld [vmem:[%s549_s0 + $0x68] sm:$0xff] }
   0x8   :  { %v20_v25 = vld [vmem:[%s549_s0 + $0x30] sm:$0xff]  ;;  %v21_v27 = vld [vmem:[%s549_s0 + $0x38] sm:$0xff]  ;;  %v276_v29 = vld [vmem:[%s550_s2] ss:$0 sm:$0xff] }
   0x9   :  { %367 = vmatpush3.bf16.msra.mxu0 %v364_v5  ;;  %382 = vmatpush3.bf16.msra.mxu1 %v364_v5  ;;  %v28_v26 = vld [vmem:[%s549_s0 + $0x70] sm:$0xff]  ;;  %v29_v28 = vld [vmem:[%s549_s0 + $0x78] sm:$0xff] }
   0xa   :  { %369 = vmatprep.subr.bf16.mxu0 %v368_v10  ;;  %378 = vmatprep.subr.bf16.mxu1 %v368_v10 }
   0xd   :  { %371 = vmatpush3.bf16.msra.mxu0 %v368_v10  ;;  %383 = vmatpush3.bf16.msra.mxu1 %v368_v10 }
   0xe   :  { %373 = vmatprep.subr.bf16.mxu0 %v372_v13  ;;  %379 = vmatprep.subr.bf16.mxu1 %v372_v13 }
  0x11   :  { %375 = vmatpush3.bf16.msra.mxu0 %v372_v13  ;;  %384 = vmatpush3.bf16.msra.mxu1 %v372_v13 }
  0x12   :  { %334 = vmatprep.subr.mxu0 %v38_v14  ;;  %380 = vmatprep.subr.mxu1 %v38_v14 }
  0x15   :  { %335 = vmatpush3.msra.mxu0 %v38_v14  ;;  %385 = vmatpush3.msra.mxu1 %v38_v14 }
  0x16   :  { %337 = vmatmul.mubr.msk.f32.vlgmr.msra.gmra.mrb[0].mxu0 %vm46_vm0, %v15_v15  ;;  %349 = vmatmul.mubr.msk.f32.vlgmr.msra.gmra.mrb[0].mxu1 %vm46_vm0, %v23_v16 }
  0x17   :  { %339 = vmatprep.mubr.msk.f32.mxu0 %vm46_vm0, %v16_v17  ;;  %351 = vmatprep.mubr.msk.f32.mxu1 %vm46_vm0, %v24_v18 }
  0x1a   :  { %340 = vmatmul.mubr.msk.f32.gmra.mrb[2].mxu0 %vm46_vm0, %v17_v19  ;;  %352 = vmatmul.mubr.msk.f32.gmra.mrb[2].mxu1 %vm46_vm0, %v25_v20 }
  0x1b   :  { %342 = vmatprep.mubr.msk.f32.mxu0 %vm46_vm0, %v18_v21  ;;  %354 = vmatprep.mubr.msk.f32.mxu1 %vm46_vm0, %v26_v22 }
  0x1e   :  { %343 = vmatmul.mubr.msk.f32.gmra.mrb[4].mxu0 %vm46_vm0, %v19_v23  ;;  %355 = vmatmul.mubr.msk.f32.gmra.mrb[4].mxu1 %vm46_vm0, %v27_v24 }
  0x1f   :  { %345 = vmatprep.mubr.msk.f32.mxu0 %vm46_vm0, %v20_v25  ;;  %357 = vmatprep.mubr.msk.f32.mxu1 %vm46_vm0, %v28_v26 }
  0x22   :  { %346 = vmatmul.mubr.msk.f32.gmra.mrb[6].mxu0 %vm46_vm0, %v21_v27  ;;  %358 = vmatmul.mubr.msk.f32.gmra.mrb[6].mxu1 %vm46_vm0, %v29_v28 }
  0xe9   :  { %v338_v30 = vpop.f32.mrb[0].mxu0  ;;  %v350_v31 = vpop.f32.mrb[0].mxu1 }
  0xea   :  { %v167_v32 = vadd.f32 %v338_v30, %v276_v29  ;;  %v207_v33 = vadd.f32 %v350_v31, %v276_v29  ;;  %v161_v34 = vpop.f32.mrb[1].mxu0  ;;  %v201_v35 = vpop.f32.mrb[1].mxu1 }
  0xeb   :  { %v162_v36 = vadd.f32 %v276_v29, %v161_v34  ;;  %v202_v37 = vadd.f32 %v276_v29, %v201_v35 }
  0xec   :  { %v241_v38 = vmax.f32 %v167_v32, 0.0  ;;  %v249_v39 = vmax.f32 %v207_v33, 0.0 }
  0xed   :  { %v240_v40 = vmax.f32 %v162_v36, 0.0  ;;  %v248_v41 = vmax.f32 %v202_v37, 0.0  ;;  %v341_v42 = vpop.f32.mrb[2].mxu0  ;;  %v353_v43 = vpop.f32.mrb[2].mxu1 }
  0xee   :  { %257 = vst [vmem:[%s551_s3 + $0x8] sm:$0xff] %v241_v38  ;;  %265 = vst [vmem:[%s551_s3 + $0x48] sm:$0xff] %v249_v39  ;;  %v177_v44 = vadd.f32 %v341_v42, %v276_v29  ;;  %v217_v45 = vadd.f32 %v353_v43, %v276_v29  ;;  %v171_v46 = vpop.f32.mrb[3].mxu0  ;;  %v211_v47 = vpop.f32.mrb[3].mxu1 }
  0xef   :  { %256 = vst [vmem:[%s551_s3] sm:$0xff] %v240_v40  ;;  %264 = vst [vmem:[%s551_s3 + $0x40] sm:$0xff] %v248_v41  ;;  %v172_v48 = vadd.f32 %v276_v29, %v171_v46  ;;  %v212_v49 = vadd.f32 %v276_v29, %v211_v47 }
  0xf0   :  { %v243_v50 = vmax.f32 %v177_v44, 0.0  ;;  %v251_v51 = vmax.f32 %v217_v45, 0.0 }
  0xf1   :  { %v242_v52 = vmax.f32 %v172_v48, 0.0  ;;  %v250_v53 = vmax.f32 %v212_v49, 0.0  ;;  %v344_v54 = vpop.f32.mrb[4].mxu0  ;;  %v356_v55 = vpop.f32.mrb[4].mxu1 }
  0xf2   :  { %259 = vst [vmem:[%s551_s3 + $0x18] sm:$0xff] %v243_v50  ;;  %267 = vst [vmem:[%s551_s3 + $0x58] sm:$0xff] %v251_v51  ;;  %v187_v56 = vadd.f32 %v344_v54, %v276_v29  ;;  %v227_v57 = vadd.f32 %v356_v55, %v276_v29  ;;  %v181_v58 = vpop.f32.mrb[5].mxu0  ;;  %v221_v59 = vpop.f32.mrb[5].mxu1 }
  0xf3   :  { %258 = vst [vmem:[%s551_s3 + $0x10] sm:$0xff] %v242_v52  ;;  %266 = vst [vmem:[%s551_s3 + $0x50] sm:$0xff] %v250_v53  ;;  %v182_v60 = vadd.f32 %v276_v29, %v181_v58  ;;  %v222_v61 = vadd.f32 %v276_v29, %v221_v59 }
  0xf4   :  { %v245_v62 = vmax.f32 %v187_v56, 0.0  ;;  %v253_v63 = vmax.f32 %v227_v57, 0.0 }
  0xf5   :  { %v244_v0 = vmax.f32 %v182_v60, 0.0  ;;  %v252_v1 = vmax.f32 %v222_v61, 0.0  ;;  %v347_v2 = vpop.f32.mrb[6].mxu0  ;;  %v359_v3 = vpop.f32.mrb[6].mxu1 }
  0xf6   :  { %261 = vst [vmem:[%s551_s3 + $0x28] sm:$0xff] %v245_v62  ;;  %269 = vst [vmem:[%s551_s3 + $0x68] sm:$0xff] %v253_v63  ;;  %v197_v4 = vadd.f32 %v347_v2, %v276_v29  ;;  %v237_v5 = vadd.f32 %v359_v3, %v276_v29  ;;  %v191_v6 = vpop.f32.mrb[7].mxu0  ;;  %v231_v7 = vpop.f32.mrb[7].mxu1 }
  0xf7   :  { %260 = vst [vmem:[%s551_s3 + $0x20] sm:$0xff] %v244_v0  ;;  %268 = vst [vmem:[%s551_s3 + $0x60] sm:$0xff] %v252_v1  ;;  %v192_v8 = vadd.f32 %v276_v29, %v191_v6  ;;  %v232_v9 = vadd.f32 %v276_v29, %v231_v7 }
  0xf8   :  { %v247_v10 = vmax.f32 %v197_v4, 0.0  ;;  %v255_v11 = vmax.f32 %v237_v5, 0.0 }
  0xf9   :  { %v246_v12 = vmax.f32 %v192_v8, 0.0  ;;  %v254_v13 = vmax.f32 %v232_v9, 0.0 }
  0xfa   :  { %263 = vst [vmem:[%s551_s3 + $0x38] sm:$0xff] %v247_v10  ;;  %271 = vst [vmem:[%s551_s3 + $0x78] sm:$0xff] %v255_v11 }
  0xfb   :  { %262 = vst [vmem:[%s551_s3 + $0x30] sm:$0xff] %v246_v12  ;;  %270 = vst [vmem:[%s551_s3 + $0x70] sm:$0xff] %v254_v13 }

// kernel: _lambda_.5
= control target key start
LH: loop header
LB: loop body
LE: loop exit
PB: predicated region body
PF: predicated region fallthrough
CT: control target
= control target key end

     0   :  { %v170_v25 = vlaneseq  ;;  %v1213_v26 = vmov 1983009808   ;;  %s1986_s0 = inlined_call_operand.vmem [shape: f32[2,512], index: 0, kind: input, shape index: {}]   ;;  %s1987_s1 = inlined_call_operand.vmem [shape: f32[512,256], index: 1, kind: input, shape index: {}]   ;;  %s1988_s2 = inlined_call_operand.vmem [shape: f32[1,256], index: 2, kind: input, shape index: {}]   ;;  %s1989_s3 = inlined_call_operand.vmem [shape: f32[256,128], index: 3, kind: input, shape index: {}]   ;;  %s1990_s4 = inlined_call_operand.vmem [shape: f32[1,128], index: 4, kind: input, shape index: {}]   ;;  %s1991_s5 = inlined_call_operand.vmem [shape: f32[128,128], index: 5, kind: input, shape index: {}]   ;;  %s1992_s6 = inlined_call_operand.vmem [shape: f32[1,128], index: 6, kind: input, shape index: {}]   ;;  %s1993_s7 = inlined_call_operand.vmem [shape: f32[128,128], index: 7, kind: input, shape index: {}]   ;;  %s1994_s8 = inlined_call_operand.vmem [shape: f32[1,128], index: 8, kind: input, shape index: {}]   ;;  %s1995_s9 = inlined_call_operand.vmem [shape: f32[128,128], index: 9, kind: input, shape index: {}]   ;;  %s1996_s10 = inlined_call_operand.vmem [shape: f32[1,128], index: 10, kind: input, shape index: {}]   ;;  %s1997_s11 = inlined_call_operand.hbm [shape: f32[2,128], index: 11, kind: output, shape index: {}]  }
   0x1   :  { %v41_v0 = vld [vmem:[%s1987_s1 + $0x8] sm:$0xff]  ;;  %v43_v1 = vld [vmem:[%s1987_s1 + $0x18] sm:$0xff]  ;;  %v40_v2 = vld [vmem:[%s1987_s1] sm:$0xff]  ;;  %v183_v27 = vunpack.c.l.s4 %v1213_v26 }
   0x2   :  { %v947_v3 = vpack.c.bf16 %v43_v1, %v41_v0  ;;  %v42_v4 = vld [vmem:[%s1987_s1 + $0x10] sm:$0xff]  ;;  %v45_v5 = vld [vmem:[%s1987_s1 + $0x28] sm:$0xff]  ;;  %v47_v6 = vld [vmem:[%s1987_s1 + $0x38] sm:$0xff]  ;;  %v1344_v34 = vshrl.u32 %v170_v25, 7 }
   0x3   :  { %v949_v7 = vpack.c.bf16 %v42_v4, %v40_v2  ;;  %v951_v8 = vpack.c.bf16 %v47_v6, %v45_v5  ;;  %v44_v9 = vld [vmem:[%s1987_s1 + $0x20] sm:$0xff]  ;;  %v46_v10 = vld [vmem:[%s1987_s1 + $0x30] sm:$0xff]  ;;  %v49_v11 = vld [vmem:[%s1987_s1 + $0x48] sm:$0xff]  ;;  %v184_v35 = vunpack.c.0.s8 %v183_v27 }
   0x4   :  { %948 = vmatprep.subr.bf16.mxu0 %v947_v3  ;;  %v51_v12 = vld [vmem:[%s1987_s1 + $0x58] sm:$0xff]  ;;  %v953_v13 = vpack.c.bf16 %v46_v10, %v44_v9  ;;  %v48_v15 = vld [vmem:[%s1987_s1 + $0x40] sm:$0xff]  ;;  %v50_v16 = vld [vmem:[%s1987_s1 + $0x50] sm:$0xff] }
   0x5   :  { %950 = vmatpush1.bf16.msra.mxu0 %v949_v7  ;;  %v955_v14 = vpack.c.bf16 %v51_v12, %v49_v11  ;;  %v53_v17 = vld [vmem:[%s1987_s1 + $0x68] sm:$0xff]  ;;  %v55_v18 = vld [vmem:[%s1987_s1 + $0x78] sm:$0xff]  ;;  %v957_v19 = vpack.c.bf16 %v50_v16, %v48_v15  ;;  %v52_v21 = vld [vmem:[%s1987_s1 + $0x60] sm:$0xff]  ;;  %v1359_v42 = vsub.s32 %v184_v35, %v1344_v34 }
   0x6   :  { %952 = vmatprep.subr.bf16.mxu0 %v951_v8  ;;  %v959_v20 = vpack.c.bf16 %v55_v18, %v53_v17  ;;  %v54_v22 = vld [vmem:[%s1987_s1 + $0x70] sm:$0xff]  ;;  %v57_v23 = vld [vmem:[%s1987_s1 + $0x88] sm:$0xff]  ;;  %v59_v24 = vld [vmem:[%s1987_s1 + $0x98] sm:$0xff] }
   0x7   :  { %v961_v28 = vpack.c.bf16 %v54_v22, %v52_v21  ;;  %v963_v29 = vpack.c.bf16 %v59_v24, %v57_v23  ;;  %v56_v30 = vld [vmem:[%s1987_s1 + $0x80] sm:$0xff]  ;;  %v58_v31 = vld [vmem:[%s1987_s1 + $0x90] sm:$0xff]  ;;  %v61_v32 = vld [vmem:[%s1987_s1 + $0xa8] sm:$0xff] }
   0x8   :  { %v63_v33 = vld [vmem:[%s1987_s1 + $0xb8] sm:$0xff]  ;;  %v965_v36 = vpack.c.bf16 %v58_v31, %v56_v30  ;;  %v60_v38 = vld [vmem:[%s1987_s1 + $0xa0] sm:$0xff]  ;;  %v62_v39 = vld [vmem:[%s1987_s1 + $0xb0] sm:$0xff] }
   0x9   :  { %954 = vmatpush1.bf16.msra.mxu0 %v953_v13  ;;  %v967_v37 = vpack.c.bf16 %v63_v33, %v61_v32  ;;  %v65_v40 = vld [vmem:[%s1987_s1 + $0xc8] sm:$0xff]  ;;  %v67_v41 = vld [vmem:[%s1987_s1 + $0xd8] sm:$0xff]  ;;  %v969_v43 = vpack.c.bf16 %v62_v39, %v60_v38  ;;  %v64_v45 = vld [vmem:[%s1987_s1 + $0xc0] sm:$0xff] }
   0xa   :  { %956 = vmatprep.subr.bf16.mxu0 %v955_v14  ;;  %v971_v44 = vpack.c.bf16 %v67_v41, %v65_v40  ;;  %v66_v46 = vld [vmem:[%s1987_s1 + $0xd0] sm:$0xff]  ;;  %v1370_v47 = vld [vmem:[%s1986_s0] sm:$0xff]  ;;  %v69_v48 = vld [vmem:[%s1987_s1 + $0xe8] sm:$0xff] }
   0xb   :  { %v71_v49 = vld [vmem:[%s1987_s1 + $0xf8] sm:$0xff]  ;;  %v1380_v50 = vrot.slane %v1370_v47, %v1359_v42  ;;  %v973_v51 = vpack.c.bf16 %v66_v46, %v64_v45  ;;  %v68_v54 = vld [vmem:[%s1987_s1 + $0xe0] sm:$0xff]  ;;  %v70_v55 = vld [vmem:[%s1987_s1 + $0xf0] sm:$0xff] }
   0xc   :  { %v975_v53 = vpack.c.bf16 %v71_v49, %v69_v48  ;;  %v73_v56 = vld [vmem:[%s1987_s1 + $0x108] sm:$0xff]  ;;  %v75_v57 = vld [vmem:[%s1987_s1 + $0x118] sm:$0xff]  ;;  %v977_v58 = vpack.c.bf16 %v70_v55, %v68_v54  ;;  %v72_v60 = vld [vmem:[%s1987_s1 + $0x100] sm:$0xff] }
   0xd   :  { %958 = vmatpush1.bf16.msra.mxu0 %v957_v19  ;;  %v196_v52 = vcombine.high %v1380_v50, %v1380_v50  ;;  %v979_v59 = vpack.c.bf16 %v75_v57, %v73_v56  ;;  %v74_v61 = vld [vmem:[%s1987_s1 + $0x110] sm:$0xff]  ;;  %v77_v62 = vld [vmem:[%s1987_s1 + $0x128] sm:$0xff]  ;;  %v79_v63 = vld [vmem:[%s1987_s1 + $0x138] sm:$0xff] }
   0xe   :  { %960 = vmatprep.subr.bf16.mxu0 %v959_v20  ;;  %v981_v0 = vpack.c.bf16 %v74_v61, %v72_v60  ;;  %v983_v1 = vpack.c.bf16 %v79_v63, %v77_v62  ;;  %v76_v2 = vld [vmem:[%s1987_s1 + $0x120] sm:$0xff]  ;;  %v78_v3 = vld [vmem:[%s1987_s1 + $0x130] sm:$0xff]  ;;  %v81_v4 = vld [vmem:[%s1987_s1 + $0x148] sm:$0xff] }
   0xf   :  { %266 = vmatprep.mubr.f32.mxu0 %v196_v52  ;;  %v83_v5 = vld [vmem:[%s1987_s1 + $0x158] sm:$0xff]  ;;  %v985_v6 = vpack.c.bf16 %v78_v3, %v76_v2  ;;  %v80_v8 = vld [vmem:[%s1987_s1 + $0x140] sm:$0xff]  ;;  %v82_v9 = vld [vmem:[%s1987_s1 + $0x150] sm:$0xff] }
  0x10   :  { %v987_v7 = vpack.c.bf16 %v83_v5, %v81_v4  ;;  %v85_v10 = vld [vmem:[%s1987_s1 + $0x168] sm:$0xff]  ;;  %v87_v11 = vld [vmem:[%s1987_s1 + $0x178] sm:$0xff]  ;;  %v989_v12 = vpack.c.bf16 %v82_v9, %v80_v8  ;;  %v84_v14 = vld [vmem:[%s1987_s1 + $0x160] sm:$0xff] }
  0x11   :  { %962 = vmatpush1.bf16.msra.mxu0 %v961_v28  ;;  %v991_v13 = vpack.c.bf16 %v87_v11, %v85_v10  ;;  %v86_v15 = vld [vmem:[%s1987_s1 + $0x170] sm:$0xff]  ;;  %v89_v16 = vld [vmem:[%s1987_s1 + $0x188] sm:$0xff]  ;;  %v91_v17 = vld [vmem:[%s1987_s1 + $0x198] sm:$0xff] }
  0x12   :  { %964 = vmatprep.subr.bf16.mxu0 %v963_v29  ;;  %v88_v18 = vld [vmem:[%s1987_s1 + $0x180] sm:$0xff]  ;;  %v90_v19 = vld [vmem:[%s1987_s1 + $0x190] sm:$0xff]  ;;  %v363_v21 = vld [vmem:[%s1989_s3 + $0x88] sm:$0xff]  ;;  %v993_v23 = vpack.c.bf16 %v86_v15, %v84_v14  ;;  %v995_v28 = vpack.c.bf16 %v91_v17, %v89_v16 }
  0x13   :  { %v362_v20 = vld [vmem:[%s1989_s3 + $0x80] sm:$0xff]  ;;  %v347_v25 = vld [vmem:[%s1989_s3 + $0x8] sm:$0xff]  ;;  %v364_v26 = vld [vmem:[%s1989_s3 + $0x90] sm:$0xff]  ;;  %v997_v39 = vpack.c.bf16 %v90_v19, %v88_v18 }
  0x14   :  { %v346_v22 = vld [vmem:[%s1989_s3] sm:$0xff]  ;;  %v1075_v24 = vpack.c.bf16 %v363_v21, %v362_v20  ;;  %v365_v27 = vld [vmem:[%s1989_s3 + $0x98] sm:$0xff]  ;;  %v348_v31 = vld [vmem:[%s1989_s3 + $0x10] sm:$0xff] }
  0x15   :  { %966 = vmatpush1.bf16.msra.mxu0 %v965_v36  ;;  %v1077_v29 = vpack.c.bf16 %v347_v25, %v346_v22  ;;  %v1079_v30 = vpack.c.bf16 %v365_v27, %v364_v26  ;;  %v349_v32 = vld [vmem:[%s1989_s3 + $0x18] sm:$0xff]  ;;  %v366_v33 = vld [vmem:[%s1989_s3 + $0xa0] sm:$0xff]  ;;  %v93_v35 = vld [vmem:[%s1987_s1 + $0x1a8] sm:$0xff] }
  0x16   :  { %968 = vmatprep.subr.bf16.mxu0 %v967_v37  ;;  %v95_v36 = vld [vmem:[%s1987_s1 + $0x1b8] sm:$0xff]  ;;  %1076 = vmatprep.subr.bf16.mxu1 %v1075_v24  ;;  %v367_v37 = vld [vmem:[%s1989_s3 + $0xa8] sm:$0xff]  ;;  %v1081_v38 = vpack.c.bf16 %v349_v32, %v348_v31  ;;  %v92_v40 = vld [vmem:[%s1987_s1 + $0x1a0] sm:$0xff] }
  0x17   :  { %1078 = vmatpush3.bf16.msra.mxu1 %v1077_v29  ;;  %v1083_v41 = vpack.c.bf16 %v367_v37, %v366_v33  ;;  %v999_v45 = vpack.c.bf16 %v95_v36, %v93_v35  ;;  %v94_v46 = vld [vmem:[%s1987_s1 + $0x1b0] sm:$0xff]  ;;  %v369_v49 = vld [vmem:[%s1989_s3 + $0xb8] sm:$0xff] }
  0x18   :  { %1080 = vmatprep.subr.bf16.mxu1 %v1079_v30  ;;  %v368_v48 = vld [vmem:[%s1989_s3 + $0xb0] sm:$0xff]  ;;  %v99_v52 = vld [vmem:[%s1987_s1 + $0x1d8] sm:$0xff]  ;;  %v1001_v55 = vpack.c.bf16 %v94_v46, %v92_v40 }
  0x19   :  { %970 = vmatpush1.bf16.msra.mxu0 %v969_v43  ;;  %v350_v43 = vld [vmem:[%s1989_s3 + $0x20] sm:$0xff]  ;;  %v1087_v56 = vpack.c.bf16 %v369_v49, %v368_v48  ;;  %v352_v57 = vld [vmem:[%s1989_s3 + $0x30] sm:$0xff] }
  0x1a   :  { %972 = vmatprep.subr.bf16.mxu0 %v971_v44  ;;  %v351_v44 = vld [vmem:[%s1989_s3 + $0x28] sm:$0xff] }
  0x1b   :  { %1082 = vmatpush3.bf16.msra.mxu1 %v1081_v38  ;;  %v1085_v54 = vpack.c.bf16 %v351_v44, %v350_v43 }
  0x1c   :  { %1084 = vmatprep.subr.bf16.mxu1 %v1083_v41 }
  0x1d   :  { %974 = vmatpush1.bf16.msra.mxu0 %v973_v51  ;;  %v97_v51 = vld [vmem:[%s1987_s1 + $0x1c8] sm:$0xff] }
  0x1e   :  { %976 = vmatprep.subr.bf16.mxu0 %v975_v53  ;;  %v96_v53 = vld [vmem:[%s1987_s1 + $0x1c0] sm:$0xff] }
  0x21   :  { %978 = vmatpush1.bf16.msra.mxu0 %v977_v58  ;;  %v353_v58 = vld [vmem:[%s1989_s3 + $0x38] sm:$0xff] }
  0x22   :  { %980 = vmatprep.subr.bf16.mxu0 %v979_v59 }
  0x25   :  { %982 = vmatpush1.bf16.msra.mxu0 %v981_v0 }
  0x26   :  { %984 = vmatprep.subr.bf16.mxu0 %v983_v1 }
  0x29   :  { %986 = vmatpush1.bf16.msra.mxu0 %v985_v6 }
  0x2a   :  { %988 = vmatprep.subr.bf16.mxu0 %v987_v7 }
  0x2d   :  { %990 = vmatpush1.bf16.msra.mxu0 %v989_v12 }
  0x2e   :  { %992 = vmatprep.subr.bf16.mxu0 %v991_v13 }
  0x31   :  { %994 = vmatpush1.bf16.msra.mxu0 %v993_v23 }
  0x32   :  { %996 = vmatprep.subr.bf16.mxu0 %v995_v28 }
  0x35   :  { %998 = vmatpush1.bf16.msra.mxu0 %v997_v39 }
  0x36   :  { %16 = vsyncpa [#allocation3], 0  ;;  %1000 = vmatprep.subr.bf16.mxu0 %v999_v45  ;;  %v1003_v59 = vpack.c.bf16 %v99_v52, %v97_v51  ;;  %v98_v60 = vld [vmem:[%s1987_s1 + $0x1d0] sm:$0xff]  ;;  %v370_v61 = vld [vmem:[%s1989_s3 + $0xc0] sm:$0xff]  ;;  %1086 = vmatpush3.bf16.msra.mxu1 %v1085_v54  ;;  %v1089_v1 = vpack.c.bf16 %v353_v58, %v352_v57  ;;  %v181_v4 = vcombine.high %v1370_v47, %v1370_v47  ;;  %vm1215_vm0 = vmmov 0   ;;  %s1217_s23 = smov [#allocation2]  }
  0x37   :  { %v371_v62 = vld [vmem:[%s1989_s3 + $0xc8] sm:$0xff]  ;;  %v103_v0 = vld [vmem:[%s1987_s1 + $0x1f8] sm:$0xff]  ;;  %v1005_v2 = vpack.c.bf16 %v98_v60, %v96_v53  ;;  %v100_v3 = vld [vmem:[%s1987_s1 + $0x1e0] sm:$0xff]  ;;  %1088 = vmatprep.subr.bf16.mxu1 %v1087_v56  ;;  %s744_s24 = sshll.u32 %s1217_s23, 4  ;;  %s745_s24 = int_to_ptr.vmem [resolvable:$true] %s744_s24 }
  0x38   :  { %v101_v63 = vld [vmem:[%s1987_s1 + $0x1e8] sm:$0xff]  ;;  %v1091_v5 = vpack.c.bf16 %v371_v62, %v370_v61  ;;  %v354_v6 = vld [vmem:[%s1989_s3 + $0x40] sm:$0xff]  ;;  %v102_v9 = vld [vmem:[%s1987_s1 + $0x1f0] sm:$0xff]  ;;  %v1561_v15 = vrot.slane %v181_v4, %v1359_v42  ;;  %p1194_p1 = scmp.lt.s32.totalorder %s745_s24, %s745_s24 }
  0x39   :  { %1002 = vmatpush1.bf16.msra.mxu0 %v1001_v55  ;;  %v355_v7 = vld [vmem:[%s1989_s3 + $0x48] sm:$0xff]  ;;  %v1007_v8 = vpack.c.bf16 %v103_v0, %v101_v63  ;;  %v372_v47 = vld [vmem:[%s1989_s3 + $0xd0] sm:$0xff]  ;;  %v373_v10 = vld [vmem:[%s1989_s3 + $0xd8] sm:$0xff]  ;;  %v1009_v14 = vpack.c.bf16 %v102_v9, %v100_v3 }
  0x3a   :  { %1004 = vmatprep.subr.bf16.mxu0 %v1003_v59  ;;  %v105_v11 = vld [vmem:[%s1987_s1 + $0x208] sm:$0xff]  ;;  %v107_v12 = vld [vmem:[%s1987_s1 + $0x218] sm:$0xff]  ;;  %1090 = vmatpush3.bf16.msra.mxu1 %v1089_v1  ;;  %v1093_v13 = vpack.c.bf16 %v355_v7, %v354_v6  ;;  %v1095_v16 = vpack.c.bf16 %v373_v10, %v372_v47  ;;  %v356_v17 = vld [vmem:[%s1989_s3 + $0x50] sm:$0xff]  ;;  %v197_v27 = vcombine.high %v1561_v15, %v1561_v15 }
  0x3b   :  { %1092 = vmatprep.subr.bf16.mxu1 %v1091_v5  ;;  %v357_v18 = vld [vmem:[%s1989_s3 + $0x58] sm:$0xff]  ;;  %v1011_v19 = vpack.c.bf16 %v107_v12, %v105_v11  ;;  %v104_v20 = vld [vmem:[%s1987_s1 + $0x200] sm:$0xff]  ;;  %v106_v42 = vld [vmem:[%s1987_s1 + $0x210] sm:$0xff] }
  0x3c   :  { %v109_v21 = vld [vmem:[%s1987_s1 + $0x228] sm:$0xff]  ;;  %v111_v22 = vld [vmem:[%s1987_s1 + $0x238] sm:$0xff]  ;;  %v374_v23 = vld [vmem:[%s1989_s3 + $0xe0] sm:$0xff]  ;;  %v1097_v25 = vpack.c.bf16 %v357_v18, %v356_v17  ;;  %v1013_v26 = vpack.c.bf16 %v106_v42, %v104_v20 }
  0x3d   :  { %1006 = vmatpush1.bf16.msra.mxu0 %v1005_v2  ;;  %v375_v24 = vld [vmem:[%s1989_s3 + $0xe8] sm:$0xff]  ;;  %v1015_v28 = vpack.c.bf16 %v111_v22, %v109_v21  ;;  %v108_v29 = vld [vmem:[%s1987_s1 + $0x220] sm:$0xff]  ;;  %v110_v30 = vld [vmem:[%s1987_s1 + $0x230] sm:$0xff] }
  0x3e   :  { %1008 = vmatprep.subr.bf16.mxu0 %v1007_v8  ;;  %1094 = vmatpush3.bf16.msra.mxu1 %v1093_v13  ;;  %v1099_v31 = vpack.c.bf16 %v375_v24, %v374_v23  ;;  %v113_v32 = vld [vmem:[%s1987_s1 + $0x248] sm:$0xff]  ;;  %v115_v33 = vld [vmem:[%s1987_s1 + $0x258] sm:$0xff]  ;;  %v1017_v35 = vpack.c.bf16 %v110_v30, %v108_v29  ;;  %v112_v37 = vld [vmem:[%s1987_s1 + $0x240] sm:$0xff] }
  0x3f   :  { %1096 = vmatprep.subr.bf16.mxu1 %v1095_v16  ;;  %v1019_v36 = vpack.c.bf16 %v115_v33, %v113_v32  ;;  %v114_v38 = vld [vmem:[%s1987_s1 + $0x250] sm:$0xff]  ;;  %v117_v39 = vld [vmem:[%s1987_s1 + $0x268] sm:$0xff]  ;;  %v116_v43 = vld [vmem:[%s1987_s1 + $0x260] sm:$0xff] }
  0x40   :  { %v1021_v40 = vpack.c.bf16 %v114_v38, %v112_v37  ;;  %v118_v44 = vld [vmem:[%s1987_s1 + $0x270] sm:$0xff]  ;;  %v121_v45 = vld [vmem:[%s1987_s1 + $0x288] sm:$0xff]  ;;  %v123_v46 = vld [vmem:[%s1987_s1 + $0x298] sm:$0xff] }
  0x41   :  { %1010 = vmatpush1.bf16.msra.mxu0 %v1009_v14  ;;  %v1025_v48 = vpack.c.bf16 %v118_v44, %v116_v43  ;;  %v1027_v49 = vpack.c.bf16 %v123_v46, %v121_v45  ;;  %v120_v51 = vld [vmem:[%s1987_s1 + $0x280] sm:$0xff]  ;;  %v122_v52 = vld [vmem:[%s1987_s1 + $0x290] sm:$0xff]  ;;  %v125_v53 = vld [vmem:[%s1987_s1 + $0x2a8] sm:$0xff] }
  0x42   :  { %1012 = vmatprep.subr.bf16.mxu0 %v1011_v19  ;;  %1098 = vmatpush3.bf16.msra.mxu1 %v1097_v25  ;;  %v127_v54 = vld [vmem:[%s1987_s1 + $0x2b8] sm:$0xff]  ;;  %v1029_v55 = vpack.c.bf16 %v122_v52, %v120_v51  ;;  %v124_v57 = vld [vmem:[%s1987_s1 + $0x2a0] sm:$0xff]  ;;  %v126_v58 = vld [vmem:[%s1987_s1 + $0x2b0] sm:$0xff] }
  0x43   :  { %1100 = vmatprep.subr.bf16.mxu1 %v1099_v31  ;;  %v1031_v56 = vpack.c.bf16 %v127_v54, %v125_v53  ;;  %v129_v59 = vld [vmem:[%s1987_s1 + $0x2c8] sm:$0xff]  ;;  %v131_v60 = vld [vmem:[%s1987_s1 + $0x2d8] sm:$0xff]  ;;  %v1033_v61 = vpack.c.bf16 %v126_v58, %v124_v57  ;;  %v128_v63 = vld [vmem:[%s1987_s1 + $0x2c0] sm:$0xff] }
  0x44   :  { %267 = vmatmul.mubr.f32.vlgmr.msra.gmra.mrb[0].mxu0 %v1380_v50  ;;  %v119_v50 = vld [vmem:[%s1987_s1 + $0x278] sm:$0xff]  ;;  %v1035_v62 = vpack.c.bf16 %v131_v60, %v129_v59  ;;  %v130_v0 = vld [vmem:[%s1987_s1 + $0x2d0] sm:$0xff]  ;;  %v133_v1 = vld [vmem:[%s1987_s1 + $0x2e8] sm:$0xff] }
  0x45   :  { %1014 = vmatpush1.bf16.msra.mxu0 %v1013_v26  ;;  %337 = vmatprep.mubr.f32.mxu0 %v197_v27  ;;  %v1023_v41 = vpack.c.bf16 %v119_v50, %v117_v39  ;;  %v135_v2 = vld [vmem:[%s1987_s1 + $0x2f8] sm:$0xff]  ;;  %v1037_v3 = vpack.c.bf16 %v130_v0, %v128_v63  ;;  %v132_v5 = vld [vmem:[%s1987_s1 + $0x2e0] sm:$0xff]  ;;  %v134_v6 = vld [vmem:[%s1987_s1 + $0x2f0] sm:$0xff] }
  0x46   :  { %1016 = vmatprep.subr.bf16.mxu0 %v1015_v28  ;;  %v1039_v4 = vpack.c.bf16 %v135_v2, %v133_v1  ;;  %v137_v7 = vld [vmem:[%s1987_s1 + $0x308] sm:$0xff]  ;;  %v139_v8 = vld [vmem:[%s1987_s1 + $0x318] sm:$0xff]  ;;  %v1041_v9 = vpack.c.bf16 %v134_v6, %v132_v5  ;;  %v136_v10 = vld [vmem:[%s1987_s1 + $0x300] sm:$0xff]  ;;  %v1214_v2 = vmov 0.0|0.0   ;;  %v176_v5 = vsub.s32 1, %v1344_v34 }
  0x47   :  { %v1043_v47 = vpack.c.bf16 %v139_v8, %v137_v7  ;;  %v138_v11 = vld [vmem:[%s1987_s1 + $0x310] sm:$0xff]  ;;  %v141_v12 = vld [vmem:[%s1987_s1 + $0x328] sm:$0xff]  ;;  %v143_v13 = vld [vmem:[%s1987_s1 + $0x338] sm:$0xff] }
  0x48   :  { %v1045_v14 = vpack.c.bf16 %v138_v11, %v136_v10  ;;  %v1047_v16 = vpack.c.bf16 %v143_v13, %v141_v12  ;;  %v140_v17 = vld [vmem:[%s1987_s1 + $0x320] sm:$0xff]  ;;  %v142_v18 = vld [vmem:[%s1987_s1 + $0x330] sm:$0xff]  ;;  %v145_v19 = vld [vmem:[%s1987_s1 + $0x348] sm:$0xff] }
  0x49   :  { %1018 = vmatpush1.bf16.msra.mxu0 %v1017_v35  ;;  %v147_v20 = vld [vmem:[%s1987_s1 + $0x358] sm:$0xff]  ;;  %v1049_v42 = vpack.c.bf16 %v142_v18, %v140_v17  ;;  %v144_v22 = vld [vmem:[%s1987_s1 + $0x340] sm:$0xff]  ;;  %v146_v23 = vld [vmem:[%s1987_s1 + $0x350] sm:$0xff] }
  0x4a   :  { %1020 = vmatprep.subr.bf16.mxu0 %v1019_v36  ;;  %v1051_v21 = vpack.c.bf16 %v147_v20, %v145_v19  ;;  %v149_v24 = vld [vmem:[%s1987_s1 + $0x368] sm:$0xff]  ;;  %v151_v25 = vld [vmem:[%s1987_s1 + $0x378] sm:$0xff]  ;;  %v1053_v26 = vpack.c.bf16 %v146_v23, %v144_v22  ;;  %v148_v28 = vld [vmem:[%s1987_s1 + $0x360] sm:$0xff] }
  0x4b   :  { %v1055_v27 = vpack.c.bf16 %v151_v25, %v149_v24  ;;  %v150_v29 = vld [vmem:[%s1987_s1 + $0x370] sm:$0xff]  ;;  %v153_v30 = vld [vmem:[%s1987_s1 + $0x388] sm:$0xff]  ;;  %v155_v31 = vld [vmem:[%s1987_s1 + $0x398] sm:$0xff] }
  0x4c   :  { %v1057_v32 = vpack.c.bf16 %v150_v29, %v148_v28  ;;  %v1059_v33 = vpack.c.bf16 %v155_v31, %v153_v30  ;;  %v152_v35 = vld [vmem:[%s1987_s1 + $0x380] sm:$0xff]  ;;  %v154_v36 = vld [vmem:[%s1987_s1 + $0x390] sm:$0xff]  ;;  %v157_v37 = vld [vmem:[%s1987_s1 + $0x3a8] sm:$0xff] }
  0x4d   :  { %1022 = vmatpush1.bf16.msra.mxu0 %v1021_v40  ;;  %v159_v38 = vld [vmem:[%s1987_s1 + $0x3b8] sm:$0xff]  ;;  %v1061_v39 = vpack.c.bf16 %v154_v36, %v152_v35  ;;  %v156_v40 = vld [vmem:[%s1987_s1 + $0x3a0] sm:$0xff]  ;;  %v161_v43 = vld [vmem:[%s1987_s1 + $0x3c8] sm:$0xff] }
  0x4e   :  { %1024 = vmatprep.subr.bf16.mxu0 %v1023_v41  ;;  %v1063_v50 = vpack.c.bf16 %v159_v38, %v157_v37  ;;  %v158_v41 = vld [vmem:[%s1987_s1 + $0x3b0] sm:$0xff]  ;;  %v163_v44 = vld [vmem:[%s1987_s1 + $0x3d8] sm:$0xff]  ;;  %v165_v51 = vld [vmem:[%s1987_s1 + $0x3e8] sm:$0xff]  ;;  %v1216_v37 = vmov 0.0  }
  0x4f   :  { %v1065_v45 = vpack.c.bf16 %v158_v41, %v156_v40  ;;  %v1067_v46 = vpack.c.bf16 %v163_v44, %v161_v43  ;;  %v167_v52 = vld [vmem:[%s1987_s1 + $0x3f8] sm:$0xff]  ;;  %v358_v58 = vld [vmem:[%s1989_s3 + $0x60] sm:$0xff]  ;;  %v359_v59 = vld [vmem:[%s1989_s3 + $0x68] sm:$0xff] }
  0x50   :  { %v1071_v54 = vpack.c.bf16 %v167_v52, %v165_v51  ;;  %v1101_v60 = vpack.c.bf16 %v359_v59, %v358_v58  ;;  %v361_v0 = vld [vmem:[%s1989_s3 + $0x78] sm:$0xff]  ;;  %v456_v10 = vld [vmem:[%s1991_s5] sm:$0xff]  ;;  %v457_v11 = vld [vmem:[%s1991_s5 + $0x8] sm:$0xff] }
  0x51   :  { %1026 = vmatpush1.bf16.msra.mxu0 %v1025_v48  ;;  %v160_v48 = vld [vmem:[%s1987_s1 + $0x3c0] sm:$0xff]  ;;  %v459_v17 = vld [vmem:[%s1991_s5 + $0x18] sm:$0xff]  ;;  %v461_v20 = vld [vmem:[%s1991_s5 + $0x28] sm:$0xff] }
  0x52   :  { %1028 = vmatprep.subr.bf16.mxu0 %v1027_v49  ;;  %v162_v49 = vld [vmem:[%s1987_s1 + $0x3d0] sm:$0xff]  ;;  %1102 = vmatpush3.bf16.msra.mxu1 %v1101_v60  ;;  %v460_v19 = vld [vmem:[%s1991_s5 + $0x20] sm:$0xff]  ;;  %v463_v22 = vld [vmem:[%s1991_s5 + $0x38] sm:$0xff] }
  0x53   :  { %v1069_v53 = vpack.c.bf16 %v162_v49, %v160_v48  ;;  %v464_v24 = vld [vmem:[%s1991_s5 + $0x40] sm:$0xff]  ;;  %v465_v25 = vld [vmem:[%s1991_s5 + $0x48] sm:$0xff]  ;;  %v467_v28 = vld [vmem:[%s1991_s5 + $0x58] sm:$0xff] }
  0x54   :  { %v468_v30 = vld [vmem:[%s1991_s5 + $0x60] sm:$0xff]  ;;  %v469_v31 = vld [vmem:[%s1991_s5 + $0x68] sm:$0xff]  ;;  %v471_v35 = vld [vmem:[%s1991_s5 + $0x78] sm:$0xff] }
  0x55   :  { %1030 = vmatpush1.bf16.msra.mxu0 %v1029_v55  ;;  %v164_v55 = vld [vmem:[%s1987_s1 + $0x3e0] sm:$0xff]  ;;  %v551_v43 = vld [vmem:[%s1993_s7 + $0x8] sm:$0xff]  ;;  %v552_v48 = vld [vmem:[%s1993_s7 + $0x10] sm:$0xff] }
  0x56   :  { %1032 = vmatprep.subr.bf16.mxu0 %v1031_v56  ;;  %v166_v56 = vld [vmem:[%s1987_s1 + $0x3f0] sm:$0xff]  ;;  %v550_v41 = vld [vmem:[%s1993_s7] sm:$0xff]  ;;  %v553_v49 = vld [vmem:[%s1993_s7 + $0x18] sm:$0xff] }
  0x57   :  { %v1073_v57 = vpack.c.bf16 %v166_v56, %v164_v55  ;;  %v1135_v51 = vpack.c.bf16 %v553_v49, %v552_v48  ;;  %v554_v52 = vld [vmem:[%s1993_s7 + $0x20] sm:$0xff]  ;;  %v556_v55 = vld [vmem:[%s1993_s7 + $0x30] sm:$0xff]  ;;  %v557_v56 = vld [vmem:[%s1993_s7 + $0x38] sm:$0xff] }
  0x58   :  { %v558_v58 = vld [vmem:[%s1993_s7 + $0x40] sm:$0xff]  ;;  %v559_v59 = vld [vmem:[%s1993_s7 + $0x48] sm:$0xff] }
  0x59   :  { %1034 = vmatpush1.bf16.msra.mxu0 %v1033_v61  ;;  %v376_v61 = vld [vmem:[%s1989_s3 + $0xf0] sm:$0xff]  ;;  %v1144_v60 = vpack.c.bf16 %v559_v59, %v558_v58 }
  0x5a   :  { %1036 = vmatprep.subr.bf16.mxu0 %v1035_v62  ;;  %v377_v62 = vld [vmem:[%s1989_s3 + $0xf8] sm:$0xff] }
  0x5b   :  { %v1103_v63 = vpack.c.bf16 %v377_v62, %v376_v61  ;;  %v560_v61 = vld [vmem:[%s1993_s7 + $0x50] sm:$0xff]  ;;  %v561_v62 = vld [vmem:[%s1993_s7 + $0x58] sm:$0xff] }
  0x5d   :  { %1038 = vmatpush1.bf16.msra.mxu0 %v1037_v3  ;;  %1104 = vmatprep.subr.bf16.mxu1 %v1103_v63  ;;  %v172_v3 = vsub.s32 0, %v1344_v34  ;;  %v458_v34 = vld [vmem:[%s1991_s5 + $0x10] sm:$0xff]  ;;  %v1147_v63 = vpack.c.bf16 %v561_v62, %v560_v61 }
  0x5e   :  { %1040 = vmatprep.subr.bf16.mxu0 %v1039_v4  ;;  %v168_v4 = vld [vmem:[%s1988_s2] sm:$0x3]  ;;  %v1111_v18 = vpack.c.bf16 %v459_v17, %v458_v34  ;;  %v649_v17 = vld [vmem:[%s1995_s9 + $0x28] sm:$0xff] }
  0x5f   :  { %v173_v6 = vrot.slane %v168_v4, %v172_v3  ;;  %v177_v7 = vrot.slane %v168_v4, %v176_v5  ;;  %v564_v3 = vld [vmem:[%s1993_s7 + $0x70] sm:$0xff]  ;;  %v565_v4 = vld [vmem:[%s1993_s7 + $0x78] sm:$0xff]  ;;  %v648_v34 = vld [vmem:[%s1995_s9 + $0x20] sm:$0xff] }
  0x60   :  { %v1153_v5 = vpack.c.bf16 %v565_v4, %v564_v3 }
  0x61   :  { %1042 = vmatpush1.bf16.msra.mxu0 %v1041_v9 }
  0x62   :  { %1044 = vmatprep.subr.bf16.mxu0 %v1043_v47 }
  0x65   :  { %1046 = vmatpush1.bf16.msra.mxu0 %v1045_v14  ;;  %v1108_v14 = vpack.c.bf16 %v457_v11, %v456_v10 }
  0x66   :  { %1048 = vmatprep.subr.bf16.mxu0 %v1047_v16 }
  0x69   :  { %1050 = vmatpush1.bf16.msra.mxu0 %v1049_v42  ;;  %v1114_v42 = vpack.c.bf16 %v461_v20, %v460_v19  ;;  %v650_v19 = vld [vmem:[%s1995_s9 + $0x30] sm:$0xff]  ;;  %v651_v20 = vld [vmem:[%s1995_s9 + $0x38] sm:$0xff] }
  0x6a   :  { %1052 = vmatprep.subr.bf16.mxu0 %v1051_v21  ;;  %v462_v21 = vld [vmem:[%s1991_s5 + $0x30] sm:$0xff] }
  0x6b   :  { %v1117_v23 = vpack.c.bf16 %v463_v22, %v462_v21  ;;  %v652_v21 = vld [vmem:[%s1995_s9 + $0x40] sm:$0xff]  ;;  %v653_v22 = vld [vmem:[%s1995_s9 + $0x48] sm:$0xff] }
  0x6d   :  { %1054 = vmatpush1.bf16.msra.mxu0 %v1053_v26  ;;  %v1120_v26 = vpack.c.bf16 %v465_v25, %v464_v24  ;;  %v654_v24 = vld [vmem:[%s1995_s9 + $0x50] sm:$0xff]  ;;  %v655_v25 = vld [vmem:[%s1995_s9 + $0x58] sm:$0xff] }
  0x6e   :  { %1056 = vmatprep.subr.bf16.mxu0 %v1055_v27  ;;  %v466_v27 = vld [vmem:[%s1991_s5 + $0x50] sm:$0xff] }
  0x6f   :  { %v1123_v29 = vpack.c.bf16 %v467_v28, %v466_v27  ;;  %v656_v27 = vld [vmem:[%s1995_s9 + $0x60] sm:$0xff]  ;;  %v657_v28 = vld [vmem:[%s1995_s9 + $0x68] sm:$0xff] }
  0x71   :  { %1058 = vmatpush1.bf16.msra.mxu0 %v1057_v32  ;;  %v1126_v32 = vpack.c.bf16 %v469_v31, %v468_v30  ;;  %v658_v30 = vld [vmem:[%s1995_s9 + $0x70] sm:$0xff]  ;;  %v659_v31 = vld [vmem:[%s1995_s9 + $0x78] sm:$0xff] }
  0x72   :  { %1060 = vmatprep.subr.bf16.mxu0 %v1059_v33  ;;  %v470_v33 = vld [vmem:[%s1991_s5 + $0x70] sm:$0xff] }
  0x73   :  { %v1129_v36 = vpack.c.bf16 %v471_v35, %v470_v33  ;;  %v754_v33 = vld [vmem:[%s1994_s8] ss:$0 sm:$0xff] }
  0x75   :  { %1062 = vmatpush1.bf16.msra.mxu0 %v1061_v39  ;;  %v752_v39 = vld [vmem:[%s1990_s4] ss:$0 sm:$0xff] }
  0x76   :  { %1064 = vmatprep.subr.bf16.mxu0 %v1063_v50 }
  0x79   :  { %1066 = vmatpush1.bf16.msra.mxu0 %v1065_v45  ;;  %v1132_v45 = vpack.c.bf16 %v551_v43, %v550_v41 }
  0x7a   :  { %1068 = vmatprep.subr.bf16.mxu0 %v1067_v46 }
  0x7d   :  { %1070 = vmatpush1.bf16.msra.mxu0 %v1069_v53  ;;  %v555_v53 = vld [vmem:[%s1993_s7 + $0x28] sm:$0xff] }
  0x7e   :  { %1072 = vmatprep.subr.bf16.mxu0 %v1071_v54  ;;  %v1138_v54 = vpack.c.bf16 %v555_v53, %v554_v52 }
  0x81   :  { %1074 = vmatpush1.bf16.msra.mxu0 %v1073_v57  ;;  %v1141_v57 = vpack.c.bf16 %v557_v56, %v556_v55 }
  0x84   :  { %338 = vmatmul.mubr.f32.vlgmr.msra.gmra.mrb[0].mxu0 %v1561_v15  ;;  %v360_v15 = vld [vmem:[%s1989_s3 + $0x70] sm:$0xff] }
  0x85   :  { %v1105_v1 = vpack.c.bf16 %v361_v0, %v360_v15  ;;  %v562_v15 = vld [vmem:[%s1993_s7 + $0x60] sm:$0xff]  ;;  %v563_v0 = vld [vmem:[%s1993_s7 + $0x68] sm:$0xff] }
  0x87   :  { %1106 = vmatpush3.bf16.msra.mxu1 %v1105_v1  ;;  %v1150_v1 = vpack.c.bf16 %v563_v0, %v562_v15 }
  0x88   :  { %1107 = vmatprep.subr.bf16.mxu1 %v1214_v2 }
 0x157   :  { %v339_v8 = vpop.f32.mrb[0].mxu0 }
 0x158   :  { %v1179_v9 = vadd.f32 %v339_v8, %v173_v6  ;;  %v341_v47 = vpop.f32.mrb[1].mxu0  ;;  %v753_v6 = vld [vmem:[%s1992_s6] ss:$0 sm:$0xff]  ;;  %v645_v8 = vld [vmem:[%s1995_s9 + $0x8] sm:$0xff] }
 0x159   :  { %v1180_v12 = vadd.f32 %v341_v47, %v177_v7  ;;  %v644_v7 = vld [vmem:[%s1995_s9] sm:$0xff] }
 0x15a   :  { %v344_v16 = vmax.f32 %v1179_v9, 0.0  ;;  %v1156_v11 = vpack.c.bf16 %v645_v8, %v644_v7 }
 0x15b   :  { %v345_v13 = vmax.f32 %v1180_v12, 0.0 }
 0x15d   :  { %449 = vmatprep.mubr.f32.mxu1 %v345_v13  ;;  %v646_v13 = vld [vmem:[%s1995_s9 + $0x10] sm:$0xff] }
 0x15e   :  { %450 = vmatmul.mubr.f32.vlgmr.msra.gmra.mrb[0].mxu1 %v344_v16 }
 0x15f   :  { %1109 = vmatpush3.bf16.msra.mxu1 %v1108_v14  ;;  %874 = vmatprep.mubr.msk.f32.mxu1 %vm1215_vm0, %v1216_v37  ;;  %v647_v14 = vld [vmem:[%s1995_s9 + $0x18] sm:$0xff]  ;;  %s1189_s9 = scalar_lea.vmem %s745_s24, 32 }
 0x160   :  { %1110 = vmatprep.subr.bf16.mxu1 %v1214_v2  ;;  %v1159_v16 = vpack.c.bf16 %v647_v14, %v646_v13  ;;  %p1190_p0 = scmp.ne.s32.totalorder %s745_s24, %s1189_s9  ;;  %p1195_p2 = scmp.lt.s32.totalorder %s1189_s9, %s1189_s9 }
 0x162   :  { %p1196_p3 = por %p1195_p2, %p1194_p1 }
 0x163   :  { %1112 = vmatpush3.bf16.msra.mxu1 %v1111_v18  ;;  %v1162_v18 = vpack.c.bf16 %v649_v17, %v648_v34 }
 0x164   :  { %1113 = vmatprep.subr.bf16.mxu1 %v1214_v2  ;;  %p1197_p4 = pnand %p1196_p3, %p1190_p0 }
 0x167   :  { %1115 = vmatpush3.bf16.msra.mxu1 %v1114_v42  ;;  %v1165_v42 = vpack.c.bf16 %v651_v20, %v650_v19 }
 0x168   :  { %1116 = vmatprep.subr.bf16.mxu1 %v1214_v2 }
 0x16b   :  { %1118 = vmatpush3.bf16.msra.mxu1 %v1117_v23  ;;  %v1168_v23 = vpack.c.bf16 %v653_v22, %v652_v21 }
 0x16c   :  { %1119 = vmatprep.subr.bf16.mxu1 %v1214_v2 }
 0x16f   :  { %1121 = vmatpush3.bf16.msra.mxu1 %v1120_v26  ;;  %v1171_v26 = vpack.c.bf16 %v655_v25, %v654_v24 }
 0x170   :  { %1122 = vmatprep.subr.bf16.mxu1 %v1214_v2 }
 0x173   :  { %1124 = vmatpush3.bf16.msra.mxu1 %v1123_v29  ;;  %v1174_v29 = vpack.c.bf16 %v657_v28, %v656_v27 }
 0x174   :  { %1125 = vmatprep.subr.bf16.mxu1 %v1214_v2 }
 0x177   :  { %1127 = vmatpush3.bf16.msra.mxu1 %v1126_v32  ;;  %v1177_v32 = vpack.c.bf16 %v659_v31, %v658_v30 }
 0x178   :  { %1128 = vmatprep.subr.bf16.mxu1 %v1214_v2 }
 0x17b   :  { %1130 = vmatpush3.bf16.msra.mxu1 %v1129_v36 }
 0x17c   :  { %1131 = vmatprep.subr.bf16.mxu1 %v1214_v2 }
 0x231   :  { %v788_v38 = vpop.f32.mrb[0].mxu1 }
 0x232   :  { %v789_v50 = vpop.f32.mrb[1].mxu1 }
 0x233   :  { %v790_v40 = vadd.f32 %v789_v50, %v788_v38 }
 0x235   :  { %v452_v44 = vadd.f32 %v790_v40, %v752_v39 }
 0x237   :  { %v455_v46 = vmax.f32 %v452_v44, 0.0 }
 0x239   :  { %875 = vmatmul.mubr.f32.vlgmr.msra.gmra.mrb[2].mxu1 %v455_v46 }
 0x23a   :  { %1133 = vmatpush3.bf16.msra.mxu1 %v1132_v45  ;;  %909 = vmatprep.mubr.msk.f32.mxu1 %vm1215_vm0, %v1216_v37 }
 0x23b   :  { %1134 = vmatprep.subr.bf16.mxu1 %v1214_v2 }
 0x23e   :  { %1136 = vmatpush3.bf16.msra.mxu1 %v1135_v51 }
 0x23f   :  { %1137 = vmatprep.subr.bf16.mxu1 %v1214_v2 }
 0x242   :  { %1139 = vmatpush3.bf16.msra.mxu1 %v1138_v54 }
 0x243   :  { %1140 = vmatprep.subr.bf16.mxu1 %v1214_v2 }
 0x246   :  { %1142 = vmatpush3.bf16.msra.mxu1 %v1141_v57 }
 0x247   :  { %1143 = vmatprep.subr.bf16.mxu1 %v1214_v2 }
 0x24a   :  { %1145 = vmatpush3.bf16.msra.mxu1 %v1144_v60 }
 0x24b   :  { %1146 = vmatprep.subr.bf16.mxu1 %v1214_v2 }
 0x24e   :  { %1148 = vmatpush3.bf16.msra.mxu1 %v1147_v63 }
 0x24f   :  { %1149 = vmatprep.subr.bf16.mxu1 %v1214_v2 }
 0x252   :  { %1151 = vmatpush3.bf16.msra.mxu1 %v1150_v1 }
 0x253   :  { %1152 = vmatprep.subr.bf16.mxu1 %v1214_v2 }
 0x256   :  { %1154 = vmatpush3.bf16.msra.mxu1 %v1153_v5 }
 0x257   :  { %1155 = vmatprep.subr.bf16.mxu1 %v1214_v2 }
 0x30c   :  { %v545_v9 = vpop.f32.mrb[2].mxu1 }
 0x30d   :  { %v546_v47 = vadd.f32 %v753_v6, %v545_v9  ;;  %v876_v10 = vpop.f32.mrb[3].mxu1 }
 0x30f   :  { %v549_v12 = vmax.f32 %v546_v47, 0.0 }
 0x311   :  { %910 = vmatmul.mubr.f32.vlgmr.msra.gmra.mrb[4].mxu1 %v549_v12 }
 0x312   :  { %1157 = vmatpush3.bf16.msra.mxu1 %v1156_v11  ;;  %944 = vmatprep.mubr.msk.f32.mxu1 %vm1215_vm0, %v1216_v37 }
 0x313   :  { %1158 = vmatprep.subr.bf16.mxu1 %v1214_v2 }
 0x316   :  { %1160 = vmatpush3.bf16.msra.mxu1 %v1159_v16 }
 0x317   :  { %1161 = vmatprep.subr.bf16.mxu1 %v1214_v2 }
 0x31a   :  { %1163 = vmatpush3.bf16.msra.mxu1 %v1162_v18 }
 0x31b   :  { %1164 = vmatprep.subr.bf16.mxu1 %v1214_v2 }
 0x31e   :  { %1166 = vmatpush3.bf16.msra.mxu1 %v1165_v42 }
 0x31f   :  { %1167 = vmatprep.subr.bf16.mxu1 %v1214_v2 }
 0x322   :  { %1169 = vmatpush3.bf16.msra.mxu1 %v1168_v23 }
 0x323   :  { %1170 = vmatprep.subr.bf16.mxu1 %v1214_v2 }
 0x326   :  { %1172 = vmatpush3.bf16.msra.mxu1 %v1171_v26 }
 0x327   :  { %1173 = vmatprep.subr.bf16.mxu1 %v1214_v2 }
 0x32a   :  { %1175 = vmatpush3.bf16.msra.mxu1 %v1174_v29 }
 0x32b   :  { %1176 = vmatprep.subr.bf16.mxu1 %v1214_v2  ;;  %v755_v2 = vld [vmem:[%s1996_s10] ss:$0 sm:$0xff] }
 0x32e   :  { %1178 = vmatpush3.bf16.msra.mxu1 %v1177_v32 }
 0x3e4   :  { %v639_v35 = vpop.f32.mrb[4].mxu1 }
 0x3e5   :  { %v640_v36 = vadd.f32 %v754_v33, %v639_v35  ;;  %v911_v37 = vpop.f32.mrb[5].mxu1 }
 0x3e7   :  { %v643_v38 = vmax.f32 %v640_v36, 0.0 }
 0x3e9   :  { %945 = vmatmul.mubr.f32.vlgmr.msra.gmra.mrb[6].mxu1 %v643_v38 }
 0x4bc   :  { %v733_v39 = vpop.f32.mrb[6].mxu1 }
 0x4bd   :  { %v734_v50 = vadd.f32 %v755_v2, %v733_v39  ;;  %v946_v40 = vpop.f32.mrb[7].mxu1 }
 0x4bf   :  { %737 = vst [vmem:[#allocation2] sm:$0x3] %v734_v50 }
 0x4c0   :  { %1200 = shalt.err (!%p1197_p4)
}
 0x4c1   :  { %s1201_s25 = scalar_lea.hbm %s1997_s11, 32 }
 0x4c2   :  { %p1202_p5 = scmp.ne.s32.totalorder %s1997_s11, %s1201_s25  ;;  %p1205_p6 = scmp.lt.u32.totalorder %s1201_s25, %s1997_s11 }
 0x4c4   :  { %p1207_p7 = pnand %p1205_p6, %p1202_p5 }
 0x4c6   :  { %1210 = shalt.err (!%p1207_p7)
}
 0x4c7   :  { %747 = dma.vmem_to_hbm [thread:$0]  %s745_s24, 32, %s1997_s11, [#allocation3]  }
 0x4c8   :  { %1211 = dma.done.wait [#allocation3], 32  }
 0x4c9   :  { %1212 = vsyncadd [#allocation3], 4294967264 }
 0x4ca   :  { %751 = vsyncpa [#allocation3], 1 }

</bundles_post_ra>
